<compile_context>
chip_gen: v5e
topology: v5e:2x2
jax: 0.10.0
libtpu: 0.0.40
codegen_flags: <defaults>
</compile_context>

<pallas_src>
import jax
import jax.numpy as jnp
from jax.experimental import pallas as pl
from jax.experimental.pallas import tpu as pltpu

H1 = 512   # 400 padded to lane multiple
H2 = 384   # 300 padded to lane multiple


def ddpg_actor_kernel(x_ref, w1_ref, b1_ref, w2_ref, b2_ref, w3_ref, b3_ref,
                      o_ref, h1_ref, h2_ref):
    # layer 1: Linear(obs, 400) + ReLU   (bf16 operands, f32 accumulate)
    h1 = jnp.dot(x_ref[...], w1_ref[...], preferred_element_type=jnp.float32)
    h1_ref[...] = jnp.maximum(h1 + b1_ref[...], 0.0).astype(jnp.bfloat16)
    # layer 2: Linear(400, 300) + ReLU
    h2 = jnp.dot(h1_ref[...], w2_ref[...], preferred_element_type=jnp.float32)
    h2_ref[...] = jnp.maximum(h2 + b2_ref[...], 0.0).astype(jnp.bfloat16)
    # layer 3: Linear(300, act) + Tanh
    h3 = jnp.dot(h2_ref[...], w3_ref[...], preferred_element_type=jnp.float32)
    o_ref[...] = jnp.tanh(h3 + b3_ref[...])


def _round_up(n, m):
    return ((n + m - 1) // m) * m


def _pad2(a, rows, cols):
    return jnp.pad(a, ((0, rows - a.shape[0]), (0, cols - a.shape[1])))


def ddpg_actor_forward(x, params, *, batch_tile=None):
    w1, b1, w2, b2, w3, b3 = params
    batch, obs_size = x.shape
    act_size = w3.shape[1]

    obs_p = _round_up(obs_size, 128)
    act_p = _round_up(act_size, 128)

    if batch_tile is None:
        # Big enough to keep the MXU busy, small enough for v7x's 64 MiB VMEM.
        batch_tile = min(512, _round_up(batch, 128))
    batch_p = _round_up(batch, batch_tile)
    grid = (batch_p // batch_tile,)

    # Pad + cast once per call. In a real actor loop these padded bf16 weights
    # should be prepared once at parameter-load time and reused across calls.
    xp = _pad2(x, batch_p, obs_p).astype(jnp.bfloat16)
    w1p = _pad2(w1, obs_p, H1).astype(jnp.bfloat16)
    w2p = _pad2(w2, H1, H2).astype(jnp.bfloat16)
    w3p = _pad2(w3, H2, act_p).astype(jnp.bfloat16)
    b1p = _pad2(b1, 1, H1)          # biases stay f32 (f32 VPU/EUP path)
    b2p = _pad2(b2, 1, H2)
    b3p = _pad2(b3, 1, act_p)

    resident = lambda i: (0, 0)     # weights/biases: same block every grid step

    out = pl.pallas_call(
        ddpg_actor_kernel,
        out_shape=jax.ShapeDtypeStruct((batch_p, act_p), jnp.float32),
        grid=grid,
        in_specs=[
            pl.BlockSpec((batch_tile, obs_p), lambda i: (i, 0)),
            pl.BlockSpec((obs_p, H1), resident),
            pl.BlockSpec((1, H1), resident),
            pl.BlockSpec((H1, H2), resident),
            pl.BlockSpec((1, H2), resident),
            pl.BlockSpec((H2, act_p), resident),
            pl.BlockSpec((1, act_p), resident),
        ],
        out_specs=pl.BlockSpec((batch_tile, act_p), lambda i: (i, 0)),
        scratch_shapes=[
            pltpu.VMEM((batch_tile, H1), jnp.bfloat16),
            pltpu.VMEM((batch_tile, H2), jnp.bfloat16),
        ],
        compiler_params=pltpu.CompilerParams(
            dimension_semantics=("parallel",),
        ),
    )(xp, w1p, b1p, w2p, b2p, w3p, b3p)

    return out[:batch, :act_size]


def init_params(key, obs_size, act_size):
    """Deterministic init mimicking PyTorch nn.Linear default:
    U(-1/sqrt(fan_in), 1/sqrt(fan_in)) for both weight and bias."""
    def linear(k, fan_in, fan_out):
        kw, kb = jax.random.split(k)
        bound = 1.0 / jnp.sqrt(fan_in)
        w = jax.random.uniform(kw, (fan_in, fan_out), jnp.float32, -bound, bound)
        b = jax.random.uniform(kb, (1, fan_out), jnp.float32, -bound, bound)
        return w, b

    k1, k2, k3 = jax.random.split(key, 3)
    w1, b1 = linear(k1, obs_size, 400)
    w2, b2 = linear(k2, 400, 300)
    w3, b3 = linear(k3, 300, act_size)
    return (w1, b1, w2, b2, w3, b3)


def reference_forward(x, params):
    """Pure-JAX reference mirroring the kernel's bf16-weight / f32-accumulate math."""
    w1, b1, w2, b2, w3, b3 = params
    xb = x.astype(jnp.bfloat16)
    h1 = jnp.dot(xb, w1.astype(jnp.bfloat16), preferred_element_type=jnp.float32) + b1
    h1 = jnp.maximum(h1, 0.0).astype(jnp.bfloat16)
    h2 = jnp.dot(h1, w2.astype(jnp.bfloat16), preferred_element_type=jnp.float32) + b2
    h2 = jnp.maximum(h2, 0.0).astype(jnp.bfloat16)
    h3 = jnp.dot(h2, w3.astype(jnp.bfloat16), preferred_element_type=jnp.float32) + b3
    return jnp.tanh(h3)


if __name__ == "__main__":
    key = jax.random.PRNGKey(0)
    k_x, k_p, k_x2 = jax.random.split(key, 3)

    obs_size, act_size = 32, 8
    params = init_params(k_p, obs_size, act_size)

    # Small RL-style batch (single grid step).
    batch = 2
    x = jax.random.normal(k_x, (batch, obs_size), jnp.float32)
    out = jax.block_until_ready(ddpg_actor_forward(x, params))
    ref = reference_forward(x, params)
    assert out.shape == (batch, act_size)
    assert jnp.allclose(out, ref, atol=2e-3, rtol=2e-3)

    # Larger batch exercising the multi-step batch grid + tail padding.
    batch2 = 300
    x2 = jax.random.normal(k_x2, (batch2, obs_size), jnp.float32)
    out2 = jax.block_until_ready(ddpg_actor_forward(x2, params, batch_tile=128))
    ref2 = reference_forward(x2, params)
    assert out2.shape == (batch2, act_size)
    assert jnp.allclose(out2, ref2, atol=2e-3, rtol=2e-3)

    print("KERNEL_OK")
</pallas_src>

<mosaic_0001>
module attributes {stable_mosaic.version = 11 : i64} {
  func.func @ddpg_actor_kernel(%arg0: i32, %arg1: memref<128x128xbf16, #tpu.memory_space<vmem>>, %arg2: memref<128x512xbf16, #tpu.memory_space<vmem>>, %arg3: memref<1x512xf32, #tpu.memory_space<vmem>>, %arg4: memref<512x384xbf16, #tpu.memory_space<vmem>>, %arg5: memref<1x384xf32, #tpu.memory_space<vmem>>, %arg6: memref<384x128xbf16, #tpu.memory_space<vmem>>, %arg7: memref<1x128xf32, #tpu.memory_space<vmem>>, %arg8: memref<128x128xf32, #tpu.memory_space<vmem>>, %arg9: memref<128x512xbf16, #tpu.memory_space<vmem>>, %arg10: memref<128x384xbf16, #tpu.memory_space<vmem>>) attributes {dimension_semantics = [#tpu.dimension_semantics<parallel>], iteration_bounds = array<i64: 1>, scalar_prefetch = 0 : i64, scratch_operands = 2 : i64, tpu.core_type = #tpu.core_type<tc>, window_params = [{transform_indices = @transform_0, window_bounds = array<i64: 128, 128>}, {pipeline_mode = #tpu.pipeline_mode<synchronous>, transform_indices = @transform_1, window_bounds = array<i64: 128, 512>}, {pipeline_mode = #tpu.pipeline_mode<synchronous>, transform_indices = @transform_2, window_bounds = array<i64: 1, 512>}, {pipeline_mode = #tpu.pipeline_mode<synchronous>, transform_indices = @transform_3, window_bounds = array<i64: 512, 384>}, {pipeline_mode = #tpu.pipeline_mode<synchronous>, transform_indices = @transform_4, window_bounds = array<i64: 1, 384>}, {pipeline_mode = #tpu.pipeline_mode<synchronous>, transform_indices = @transform_5, window_bounds = array<i64: 384, 128>}, {pipeline_mode = #tpu.pipeline_mode<synchronous>, transform_indices = @transform_6, window_bounds = array<i64: 1, 128>}, {transform_indices = @transform_7, window_bounds = array<i64: 128, 128>}]} {
    %c0 = arith.constant 0 : index
    %c0_0 = arith.constant 0 : index
    %0 = vector.load %arg1[%c0, %c0_0] : memref<128x128xbf16, #tpu.memory_space<vmem>>, vector<128x128xbf16>
    %c0_1 = arith.constant 0 : index
    %c0_2 = arith.constant 0 : index
    %1 = vector.load %arg2[%c0_1, %c0_2] : memref<128x512xbf16, #tpu.memory_space<vmem>>, vector<128x512xbf16>
    %cst = arith.constant dense<0.000000e+00> : vector<128x512xf32>
    %2 = tpu.matmul %0, %1, %cst {dimension_numbers = #tpu.dot_dimension_numbers<[1], [0], [0], [1], [0, 0, 1, 1], [], []>} : vector<128x128xbf16>, vector<128x512xbf16>, vector<128x512xf32> -> vector<128x512xf32>
    %c0_3 = arith.constant 0 : index
    %c0_4 = arith.constant 0 : index
    %3 = vector.load %arg3[%c0_3, %c0_4] : memref<1x512xf32, #tpu.memory_space<vmem>>, vector<1x512xf32>
    %4 = vector.broadcast %3 : vector<1x512xf32> to vector<128x512xf32>
    %5 = arith.addf %2, %4 : vector<128x512xf32>
    %cst_5 = arith.constant 0.000000e+00 : f32
    %6 = vector.broadcast %cst_5 : f32 to vector<128x512xf32>
    %7 = arith.maximumf %5, %6 : vector<128x512xf32>
    %8 = arith.truncf %7 : vector<128x512xf32> to vector<128x512xbf16>
    %c0_6 = arith.constant 0 : index
    %c0_7 = arith.constant 0 : index
    %9 = vector.load %arg9[%c0_6, %c0_7] : memref<128x512xbf16, #tpu.memory_space<vmem>>, vector<128x512xbf16>
    tpu.vector_store %arg9[%c0_6, %c0_7], %8 {strides = array<i32>} : memref<128x512xbf16, #tpu.memory_space<vmem>>, vector<128x512xbf16>,
    %c0_8 = arith.constant 0 : index
    %c0_9 = arith.constant 0 : index
    %10 = vector.load %arg9[%c0_8, %c0_9] : memref<128x512xbf16, #tpu.memory_space<vmem>>, vector<128x512xbf16>
    %c0_10 = arith.constant 0 : index
    %c0_11 = arith.constant 0 : index
    %11 = vector.load %arg4[%c0_10, %c0_11] : memref<512x384xbf16, #tpu.memory_space<vmem>>, vector<512x384xbf16>
    %cst_12 = arith.constant dense<0.000000e+00> : vector<128x384xf32>
    %12 = tpu.matmul %10, %11, %cst_12 {dimension_numbers = #tpu.dot_dimension_numbers<[1], [0], [0], [1], [0, 0, 1, 1], [], []>} : vector<128x512xbf16>, vector<512x384xbf16>, vector<128x384xf32> -> vector<128x384xf32>
    %c0_13 = arith.constant 0 : index
    %c0_14 = arith.constant 0 : index
    %13 = vector.load %arg5[%c0_13, %c0_14] : memref<1x384xf32, #tpu.memory_space<vmem>>, vector<1x384xf32>
    %14 = vector.broadcast %13 : vector<1x384xf32> to vector<128x384xf32>
    %15 = arith.addf %12, %14 : vector<128x384xf32>
    %cst_15 = arith.constant 0.000000e+00 : f32
    %16 = vector.broadcast %cst_15 : f32 to vector<128x384xf32>
    %17 = arith.maximumf %15, %16 : vector<128x384xf32>
    %18 = arith.truncf %17 : vector<128x384xf32> to vector<128x384xbf16>
    %c0_16 = arith.constant 0 : index
    %c0_17 = arith.constant 0 : index
    %19 = vector.load %arg10[%c0_16, %c0_17] : memref<128x384xbf16, #tpu.memory_space<vmem>>, vector<128x384xbf16>
    tpu.vector_store %arg10[%c0_16, %c0_17], %18 {strides = array<i32>} : memref<128x384xbf16, #tpu.memory_space<vmem>>, vector<128x384xbf16>,
    %c0_18 = arith.constant 0 : index
    %c0_19 = arith.constant 0 : index
    %20 = vector.load %arg10[%c0_18, %c0_19] : memref<128x384xbf16, #tpu.memory_space<vmem>>, vector<128x384xbf16>
    %c0_20 = arith.constant 0 : index
    %c0_21 = arith.constant 0 : index
    %21 = vector.load %arg6[%c0_20, %c0_21] : memref<384x128xbf16, #tpu.memory_space<vmem>>, vector<384x128xbf16>
    %cst_22 = arith.constant dense<0.000000e+00> : vector<128x128xf32>
    %22 = tpu.matmul %20, %21, %cst_22 {dimension_numbers = #tpu.dot_dimension_numbers<[1], [0], [0], [1], [0, 0, 1, 1], [], []>} : vector<128x384xbf16>, vector<384x128xbf16>, vector<128x128xf32> -> vector<128x128xf32>
    %c0_23 = arith.constant 0 : index
    %c0_24 = arith.constant 0 : index
    %23 = vector.load %arg7[%c0_23, %c0_24] : memref<1x128xf32, #tpu.memory_space<vmem>>, vector<1x128xf32>
    %24 = vector.broadcast %23 : vector<1x128xf32> to vector<128x128xf32>
    %25 = arith.addf %22, %24 : vector<128x128xf32>
    %26 = math.tanh %25 : vector<128x128xf32>
    %c0_25 = arith.constant 0 : index
    %c0_26 = arith.constant 0 : index
    %27 = vector.load %arg8[%c0_25, %c0_26] : memref<128x128xf32, #tpu.memory_space<vmem>>, vector<128x128xf32>
    tpu.vector_store %arg8[%c0_25, %c0_26], %26 {strides = array<i32>} : memref<128x128xf32, #tpu.memory_space<vmem>>, vector<128x128xf32>,
    return
  }
  func.func @transform_0(%arg0: i32) -> (i32, i32) {
    %c0_i32 = arith.constant 0 : i32
    %c0_i32_0 = arith.constant 0 : i32
    return %arg0, %c0_i32 : i32, i32
  }
  func.func @transform_1(%arg0: i32) -> (i32, i32) {
    %c0_i32 = arith.constant 0 : i32
    %c0_i32_0 = arith.constant 0 : i32
    %c0_i32_1 = arith.constant 0 : i32
    return %c0_i32, %c0_i32_0 : i32, i32
  }
  func.func @transform_2(%arg0: i32) -> (i32, i32) {
    %c0_i32 = arith.constant 0 : i32
    %c0_i32_0 = arith.constant 0 : i32
    %c0_i32_1 = arith.constant 0 : i32
    return %c0_i32, %c0_i32_0 : i32, i32
  }
  func.func @transform_3(%arg0: i32) -> (i32, i32) {
    %c0_i32 = arith.constant 0 : i32
    %c0_i32_0 = arith.constant 0 : i32
    %c0_i32_1 = arith.constant 0 : i32
    return %c0_i32, %c0_i32_0 : i32, i32
  }
  func.func @transform_4(%arg0: i32) -> (i32, i32) {
    %c0_i32 = arith.constant 0 : i32
    %c0_i32_0 = arith.constant 0 : i32
    %c0_i32_1 = arith.constant 0 : i32
    return %c0_i32, %c0_i32_0 : i32, i32
  }
  func.func @transform_5(%arg0: i32) -> (i32, i32) {
    %c0_i32 = arith.constant 0 : i32
    %c0_i32_0 = arith.constant 0 : i32
    %c0_i32_1 = arith.constant 0 : i32
    return %c0_i32, %c0_i32_0 : i32, i32
  }
  func.func @transform_6(%arg0: i32) -> (i32, i32) {
    %c0_i32 = arith.constant 0 : i32
    %c0_i32_0 = arith.constant 0 : i32
    %c0_i32_1 = arith.constant 0 : i32
    return %c0_i32, %c0_i32_0 : i32, i32
  }
  func.func @transform_7(%arg0: i32) -> (i32, i32) {
    %c0_i32 = arith.constant 0 : i32
    %c0_i32_0 = arith.constant 0 : i32
    return %arg0, %c0_i32 : i32, i32
  }
}

</mosaic_0001>

<bundles_post_ra>
// kernel: tpu_custom_call.1
= control target key start
LH: loop header
LB: loop body
LE: loop exit
PB: predicated region body
PF: predicated region fallthrough
CT: control target
= control target key end

     0   :  { %12 = vsyncpa [#allocation5], 0  ;;  %s4779_s0 = inlined_call_operand.hbm [shape: bf16[128,128], index: 0, kind: input, shape index: {}]   ;;  %s4780_s1 = inlined_call_operand.hbm [shape: bf16[128,512], index: 1, kind: input, shape index: {}]   ;;  %s4781_s2 = inlined_call_operand.hbm [shape: f32[1,512], index: 2, kind: input, shape index: {}]   ;;  %s4782_s3 = inlined_call_operand.hbm [shape: bf16[512,384], index: 3, kind: input, shape index: {}]   ;;  %s4783_s4 = inlined_call_operand.vmem [shape: f32[1,384], index: 4, kind: input, shape index: {}]   ;;  %s4784_s5 = inlined_call_operand.hbm [shape: bf16[384,128], index: 5, kind: input, shape index: {}]   ;;  %s4785_s6 = inlined_call_operand.vmem [shape: f32[1,128], index: 6, kind: input, shape index: {}]   ;;  %s4786_s7 = inlined_call_operand.hbm [shape: f32[128,128], index: 7, kind: output, shape index: {}]  }
   0x1   :  { %13 = vsyncpa [#allocation8], 0 }
   0x2   :  { %14 = vsyncpa [#allocation11], 0  ;;  %s33_s26 = sshll.u32 %s4780_s1, 4  ;;  %s34_s26 = int_to_ptr.hbm [resolvable:$true] %s33_s26 }
   0x3   :  { %15 = vsyncpa [#allocation6], 0  ;;  %s4093_s27 = smov [#allocation7]   ;;  %s57_s8 = sshll.u32 %s4782_s3, 4  ;;  %s58_s8 = int_to_ptr.hbm [resolvable:$true] %s57_s8 }
   0x4   :  { %s35_s28 = sshll.u32 %s4093_s27, 4  ;;  %s4094_s9 = smov 256   ;;  %s36_s28 = int_to_ptr.vmem [resolvable:$true] %s35_s28 }
   0x5   :  { %s4095_s10 = smov 16   ;;  %s4096_s11 = smov [#allocation10]  }
   0x6   :  { %41 = dma.hbm_to_vmem [thread:$0]  %s34_s26, 4096, %s36_s28, [#allocation8], %s4094_s9, %s4094_s9, %s4095_s10  }
   0x7   :  { %s59_s12 = sshll.u32 %s4096_s11, 4  ;;  %s4097_s13 = smov 192   ;;  %s60_s12 = int_to_ptr.vmem [resolvable:$true] %s59_s12 }
   0x8   :  { %s4098_s14 = smov 12   ;;  %s20_s16 = sshll.u32 %s4779_s0, 4  ;;  %s21_s16 = int_to_ptr.hbm [resolvable:$true] %s20_s16 }
   0x9   :  { %65 = dma.hbm_to_vmem [thread:$0]  %s58_s8, 12288, %s60_s12, [#allocation11], %s4097_s13, %s4097_s13, %s4098_s14  }
   0xa   :  { %s4099_s17 = smov [#allocation4]   ;;  %s47_s20 = sshll.u32 %s4781_s2, 4  ;;  %s48_s20 = int_to_ptr.hbm [resolvable:$true] %s47_s20 }
   0xb   :  { %s22_s18 = sshll.u32 %s4099_s17, 4  ;;  %s4100_s21 = smov 64   ;;  %s23_s18 = int_to_ptr.vmem [resolvable:$true] %s22_s18 }
   0xc   :  { %s4101_s22 = smov 4   ;;  %s4102_s23 = smov [#allocation9]  }
   0xd   :  { %28 = dma.hbm_to_vmem [thread:$0]  %s21_s16, 1024, %s23_s18, [#allocation5], %s4100_s21, %s4100_s21, %s4101_s22  }
   0xe   :  { %s49_s24 = sshll.u32 %s4102_s23, 4  ;;  %s72_s27 = sshll.u32 %s4784_s5, 4  ;;  %s50_s24 = int_to_ptr.vmem [resolvable:$true] %s49_s24  ;;  %s73_s27 = int_to_ptr.hbm [resolvable:$true] %s72_s27 }
   0xf   :  { %52 = dma.hbm_to_vmem [thread:$0]  %s48_s20, 64, %s50_s24, [#allocation8]  }
  0x10   :  { %s4103_s0 = smov [#allocation12]  }
  0x11   :  { %s74_s28 = sshll.u32 %s4103_s0, 4  ;;  %s75_s28 = int_to_ptr.vmem [resolvable:$true] %s74_s28 }
  0x12   :  { %80 = dma.hbm_to_vmem [thread:$0]  %s73_s27, 3072, %s75_s28, [#allocation11], %s4100_s21, %s4100_s21, %s4101_s22  }
  0x13   :  { %4085 = dma.done.wait [#allocation5], 1024  }
  0x14   :  { %4086 = vsyncadd [#allocation5], 4294966272 }
  0x15   :  { %4087 = dma.done.wait [#allocation8], 4160  }
  0x16   :  { %4088 = vsyncadd [#allocation8], 4294963136 }
  0x17   :  { %4089 = dma.done.wait [#allocation11], 15360  }
  0x18   :  { %4090 = vsyncadd [#allocation11], 4294951936  ;;  %v2935_v0 = vld [vmem:[#allocation7 + $0xe0] sm:$0xf]  ;;  %v3691_v1 = vld [vmem:[#allocation7 + $0xec] sm:$0xf0] }
  0x19   :  { %v2919_v2 = vld [vmem:[#allocation7 + $0xc0] sm:$0xf]  ;;  %v2936_v3 = vor.u32 %v3691_v1, %v2935_v0  ;;  %v3687_v4 = vld [vmem:[#allocation7 + $0xcc] sm:$0xf0]  ;;  %v3689_v5 = vld [vmem:[#allocation7 + $0xe4] sm:$0xf] }
  0x1a   :  { %v2937_v6 = vld [vmem:[#allocation7 + $0xf0] sm:$0xf0]  ;;  %v3685_v8 = vld [vmem:[#allocation7 + $0xc4] sm:$0xf]  ;;  %v2920_v9 = vor.u32 %v3687_v4, %v2919_v2  ;;  %v2903_v11 = vld [vmem:[#allocation7 + $0xa0] sm:$0xf] }
  0x1b   :  { %v4162_v7 = vor.u32 %v3689_v5, %v2937_v6  ;;  %369 = vmatpush.bf16.msra.mxu0 %v2936_v3  ;;  %3869 = vmatpush.bf16.msra.mxu3 %v2936_v3  ;;  %v2921_v10 = vld [vmem:[#allocation7 + $0xd0] sm:$0xf0]  ;;  %v3683_v12 = vld [vmem:[#allocation7 + $0xac] sm:$0xf0]  ;;  %v3681_v14 = vld [vmem:[#allocation7 + $0xa4] sm:$0xf] }
  0x1c   :  { %v4165_v13 = vor.u32 %v3685_v8, %v2921_v10  ;;  %v2905_v15 = vld [vmem:[#allocation7 + $0xb0] sm:$0xf0]  ;;  %v2904_v16 = vor.u32 %v3683_v12, %v2903_v11  ;;  %v2887_v17 = vld [vmem:[#allocation7 + $0x80] sm:$0xf]  ;;  %v3679_v18 = vld [vmem:[#allocation7 + $0x8c] sm:$0xf0] }
  0x1d   :  { %3877 = vmatpush.bf16.msra.mxu1 %v4162_v7  ;;  %v4168_v19 = vor.u32 %v3681_v14, %v2905_v15  ;;  %v3677_v20 = vld [vmem:[#allocation7 + $0x84] sm:$0xf]  ;;  %v2889_v21 = vld [vmem:[#allocation7 + $0x90] sm:$0xf0]  ;;  %v2888_v22 = vor.u32 %v3679_v18, %v2887_v17  ;;  %v2871_v23 = vld [vmem:[#allocation7 + $0x60] sm:$0xf] }
  0x1e   :  { %v3675_v24 = vld [vmem:[#allocation7 + $0x6c] sm:$0xf0]  ;;  %v2892_v25 = vor.u32 %v3677_v20, %v2889_v21  ;;  %v3673_v26 = vld [vmem:[#allocation7 + $0x64] sm:$0xf]  ;;  %v2873_v27 = vld [vmem:[#allocation7 + $0x70] sm:$0xf0] }
  0x1f   :  { %370 = vmatpush.bf16.msra.mxu0 %v2920_v9  ;;  %3870 = vmatpush.bf16.msra.mxu3 %v2920_v9  ;;  %v2872_v28 = vor.u32 %v3675_v24, %v2871_v23  ;;  %v2855_v29 = vld [vmem:[#allocation7 + $0x40] sm:$0xf]  ;;  %v3671_v30 = vld [vmem:[#allocation7 + $0x4c] sm:$0xf0]  ;;  %v2876_v31 = vor.u32 %v3673_v26, %v2873_v27  ;;  %v3669_v32 = vld [vmem:[#allocation7 + $0x44] sm:$0xf] }
  0x20   :  { %v2857_v33 = vld [vmem:[#allocation7 + $0x50] sm:$0xf0]  ;;  %v2856_v34 = vor.u32 %v3671_v30, %v2855_v29  ;;  %v2839_v35 = vld [vmem:[#allocation7 + $0x20] sm:$0xf]  ;;  %v3667_v36 = vld [vmem:[#allocation7 + $0x2c] sm:$0xf0] }
  0x21   :  { %3878 = vmatpush.bf16.msra.mxu1 %v4165_v13  ;;  %v2860_v37 = vor.u32 %v3669_v32, %v2857_v33  ;;  %v3665_v38 = vld [vmem:[#allocation7 + $0x24] sm:$0xf]  ;;  %v2841_v39 = vld [vmem:[#allocation7 + $0x30] sm:$0xf0]  ;;  %v2840_v40 = vor.u32 %v3667_v36, %v2839_v35  ;;  %v2823_v41 = vld [vmem:[#allocation7] sm:$0xf] }
  0x22   :  { %v3663_v42 = vld [vmem:[#allocation7 + $0xc] sm:$0xf0]  ;;  %v2844_v43 = vor.u32 %v3665_v38, %v2841_v39  ;;  %v3690_v44 = vld [vmem:[#allocation7 + $0xec] sm:$0xf]  ;;  %v2945_v45 = vld [vmem:[#allocation7 + $0xf8] sm:$0xf0] }
  0x23   :  { %371 = vmatpush.bf16.msra.mxu0 %v2904_v16  ;;  %3871 = vmatpush.bf16.msra.mxu3 %v2904_v16  ;;  %v3661_v46 = vld [vmem:[#allocation7 + $0x4] sm:$0xf]  ;;  %v2825_v47 = vld [vmem:[#allocation7 + $0x10] sm:$0xf0]  ;;  %v2824_v48 = vor.u32 %v3663_v42, %v2823_v41  ;;  %v2948_v49 = vor.u32 %v3690_v44, %v2945_v45  ;;  %v3686_v53 = vld [vmem:[#allocation7 + $0xcc] sm:$0xf] }
  0x24   :  { %v4171_v50 = vld [vmem:[#allocation4] sm:$0xff]  ;;  %v2828_v51 = vor.u32 %v3661_v46, %v2825_v47  ;;  %v4173_v52 = vld [vmem:[#allocation4 + $0x10] sm:$0xff]  ;;  %v2929_v54 = vld [vmem:[#allocation7 + $0xd8] sm:$0xf0]  ;;  %s2774_s12 = sshll.u32 %s4786_s7, 4  ;;  %s4105_s13 = smov 128   ;;  %s2775_s12 = int_to_ptr.hbm [resolvable:$true] %s2774_s12 }
  0x25   :  { %3879 = vmatpush.bf16.msra.mxu1 %v4168_v19  ;;  %v2932_v55 = vor.u32 %v3686_v53, %v2929_v54  ;;  %v3682_v56 = vld [vmem:[#allocation7 + $0xac] sm:$0xf]  ;;  %v2913_v57 = vld [vmem:[#allocation7 + $0xb8] sm:$0xf0]  ;;  %v2943_v5 = vld [vmem:[#allocation7 + $0xe8] sm:$0xf] }
  0x26   :  { %v2916_v58 = vor.u32 %v3682_v56, %v2913_v57  ;;  %v3678_v59 = vld [vmem:[#allocation7 + $0x8c] sm:$0xf]  ;;  %v2897_v60 = vld [vmem:[#allocation7 + $0x98] sm:$0xf0]  ;;  %v4188_v9 = vld [vmem:[#allocation4 + $0x20] sm:$0xff]  ;;  %s4106_s14 = smov 8  }
  0x27   :  { %372 = vmatpush.bf16.msra.mxu0 %v2888_v22  ;;  %3872 = vmatpush.bf16.msra.mxu3 %v2888_v22  ;;  %v2900_v61 = vor.u32 %v3678_v59, %v2897_v60  ;;  %v4181_v62 = vld [vmem:[#allocation4 + $0x8] sm:$0xff]  ;;  %v4183_v63 = vld [vmem:[#allocation4 + $0x18] sm:$0xff]  ;;  %v4198_v38 = vld [vmem:[#allocation4 + $0x30] sm:$0xff] }
  0x28   :  { %v3674_v0 = vld [vmem:[#allocation7 + $0x6c] sm:$0xf]  ;;  %v2881_v1 = vld [vmem:[#allocation7 + $0x78] sm:$0xf0]  ;;  %v2927_v10 = vld [vmem:[#allocation7 + $0xc8] sm:$0xf] }
  0x29   :  { %3880 = vmatpush.bf16.msra.mxu1 %v2892_v25  ;;  %v2884_v2 = vor.u32 %v3674_v0, %v2881_v1  ;;  %v3670_v3 = vld [vmem:[#allocation7 + $0x4c] sm:$0xf]  ;;  %v2865_v4 = vld [vmem:[#allocation7 + $0x58] sm:$0xf0]  ;;  %v3688_v11 = vld [vmem:[#allocation7 + $0xd4] sm:$0xf0] }
  0x2a   :  { %v2868_v6 = vor.u32 %v3670_v3, %v2865_v4  ;;  %v2928_v12 = vor.u32 %v3688_v11, %v2927_v10  ;;  %v3684_v14 = vld [vmem:[#allocation7 + $0xb4] sm:$0xf0]  ;;  %v3666_v15 = vld [vmem:[#allocation7 + $0x2c] sm:$0xf]  ;;  %v2849_v17 = vld [vmem:[#allocation7 + $0x38] sm:$0xf0] }
  0x2b   :  { %373 = vmatpush.bf16.msra.mxu0 %v2872_v28  ;;  %3873 = vmatpush.bf16.msra.mxu3 %v2872_v28  ;;  %v2852_v18 = vor.u32 %v3666_v15, %v2849_v17  ;;  %v3680_v20 = vld [vmem:[#allocation7 + $0x94] sm:$0xf0]  ;;  %v2879_v22 = vld [vmem:[#allocation7 + $0x68] sm:$0xf]  ;;  %v3662_v28 = vld [vmem:[#allocation7 + $0xc] sm:$0xf] }
  0x2c   :  { %v3676_v23 = vld [vmem:[#allocation7 + $0x74] sm:$0xf0]  ;;  %v2863_v26 = vld [vmem:[#allocation7 + $0x48] sm:$0xf]  ;;  %v2833_v30 = vld [vmem:[#allocation7 + $0x18] sm:$0xf0] }
  0x2d   :  { %3881 = vmatpush.bf16.msra.mxu1 %v2876_v31  ;;  %v2880_v24 = vor.u32 %v3676_v23, %v2879_v22  ;;  %v3672_v27 = vld [vmem:[#allocation7 + $0x54] sm:$0xf0]  ;;  %v2847_v32 = vld [vmem:[#allocation7 + $0x28] sm:$0xf]  ;;  %v3816_v44 = vld [vmem:[#allocation10 + $0x2d8] sm:$0xf0] }
  0x2e   :  { %v2864_v29 = vor.u32 %v3672_v27, %v2863_v26  ;;  %v3668_v33 = vld [vmem:[#allocation7 + $0x34] sm:$0xf0]  ;;  %v2831_v35 = vld [vmem:[#allocation7 + $0x8] sm:$0xf]  ;;  %v3163_v46 = vld [vmem:[#allocation10 + $0xa8] sm:$0xf] }
  0x2f   :  { %374 = vmatpush.bf16.msra.mxu0 %v2856_v34  ;;  %3874 = vmatpush.bf16.msra.mxu3 %v2856_v34  ;;  %v2848_v34 = vor.u32 %v3668_v33, %v2847_v32  ;;  %v3664_v36 = vld [vmem:[#allocation7 + $0x14] sm:$0xf0]  ;;  %v4214_v54 = vld [vmem:[#allocation9] sm:$0xf]  ;;  %v3247_v56 = vld [vmem:[#allocation10 + $0x150] sm:$0xf] }
  0x30   :  { %v4204_v39 = vld [vmem:[#allocation4 + $0x38] sm:$0xff]  ;;  %v4217_v60 = vperm.slane %v4214_v54, 1  ;;  %v3765_v3 = vld [vmem:[#allocation10 + $0x140] sm:$0xf0]  ;;  %v3738_v10 = vld [vmem:[#allocation10 + $0x68] sm:$0xf0] }
  0x31   :  { %3882 = vmatpush.bf16.msra.mxu1 %v2860_v37  ;;  %v3819_v41 = vld [vmem:[#allocation10 + $0x2f0] sm:$0xf0]  ;;  %v3235_v0 = vld [vmem:[#allocation10 + $0x138] sm:$0xf]  ;;  %v3813_v22 = vld [vmem:[#allocation10 + $0x2c0] sm:$0xf0] }
  0x32   :  { %v3747_v47 = vld [vmem:[#allocation10 + $0xb0] sm:$0xf0]  ;;  %v3236_v4 = vor.u32 %v3765_v3, %v3235_v0  ;;  %v3211_v27 = vld [vmem:[#allocation10 + $0x108] sm:$0xf]  ;;  %v3079_v0 = vld [vmem:[#allocation10] sm:$0xf] }
  0x33   :  { %375 = vmatpush.bf16.msra.mxu0 %v2840_v40  ;;  %3875 = vmatpush.bf16.msra.mxu3 %v2840_v40  ;;  %v3451_v40 = vld [vmem:[#allocation10 + $0x2e8] sm:$0xf]  ;;  %v3795_v15 = vld [vmem:[#allocation10 + $0x230] sm:$0xf0] }
  0x34   :  { %v3452_v42 = vor.u32 %v3819_v41, %v3451_v40  ;;  %v3735_v26 = vld [vmem:[#allocation10 + $0x50] sm:$0xf0]  ;;  %v3199_v40 = vld [vmem:[#allocation10 + $0xf0] sm:$0xf]  ;;  %v3756_v41 = vld [vmem:[#allocation10 + $0xf8] sm:$0xf0] }
  0x35   :  { %3883 = vmatpush.bf16.msra.mxu1 %v2844_v43 }
  0x37   :  { %376 = vmatpush.bf16.msra.mxu0 %v2824_v48  ;;  %3876 = vmatpush.bf16.msra.mxu3 %v2824_v48  ;;  %v3259_v48 = vld [vmem:[#allocation10 + $0x168] sm:$0xf] }
  0x39   :  { %3884 = vmatpush.bf16.msra.mxu1 %v2828_v51 }
  0x3a   :  { %377 = vmatmul.bf16.vlgmr.msra.gmra.mxu0 %v4171_v50  ;;  %387 = vmatmul.bf16.vlgmr.msra.gmra.mxu3 %v4173_v52 }
  0x3b   :  { %516 = vmatpush.bf16.msrb.mxu3 %v2948_v49  ;;  %418 = vmatpush.bf16.msrb.mxu0 %v4162_v7  ;;  %v3692_v7 = vld [vmem:[#allocation7 + $0xf4] sm:$0xf0]  ;;  %v3164_v49 = vor.u32 %v3747_v47, %v3163_v46  ;;  %v3343_v46 = vld [vmem:[#allocation10 + $0x210] sm:$0xf]  ;;  %v3792_v47 = vld [vmem:[#allocation10 + $0x218] sm:$0xf0] }
  0x3c   :  { %436 = vmatmul.bf16.vlgmr.msra.gmra.mxu1 %v4173_v52  ;;  %v2944_v8 = vor.u32 %v3692_v7, %v2943_v5 }
  0x3e   :  { %3885 = vmatpush.bf16.msra.mxu2 %v2944_v8 }
  0x3f   :  { %419 = vmatpush.bf16.msrb.mxu0 %v4165_v13  ;;  %517 = vmatpush.bf16.msrb.mxu3 %v2932_v55  ;;  %v2911_v13 = vld [vmem:[#allocation7 + $0xa8] sm:$0xf]  ;;  %v3744_v55 = vld [vmem:[#allocation10 + $0x98] sm:$0xf0] }
  0x40   :  { %v2912_v16 = vor.u32 %v3684_v14, %v2911_v13  ;;  %v3762_v13 = vld [vmem:[#allocation10 + $0x128] sm:$0xf0]  ;;  %v3355_v14 = vld [vmem:[#allocation10 + $0x228] sm:$0xf] }
  0x42   :  { %3886 = vmatpush.bf16.msra.mxu2 %v2928_v12 }
  0x43   :  { %420 = vmatpush.bf16.msrb.mxu0 %v4168_v19  ;;  %518 = vmatpush.bf16.msrb.mxu3 %v2916_v58  ;;  %v2895_v19 = vld [vmem:[#allocation7 + $0x88] sm:$0xf]  ;;  %v3768_v58 = vld [vmem:[#allocation10 + $0x158] sm:$0xf0] }
  0x44   :  { %v2896_v21 = vor.u32 %v3680_v20, %v2895_v19  ;;  %v3248_v59 = vor.u32 %v3768_v58, %v3247_v56  ;;  %v3356_v19 = vor.u32 %v3795_v15, %v3355_v14 }
  0x46   :  { %3887 = vmatpush.bf16.msra.mxu2 %v2912_v16 }
  0x47   :  { %421 = vmatpush.bf16.msrb.mxu0 %v2892_v25  ;;  %519 = vmatpush.bf16.msrb.mxu3 %v2900_v61  ;;  %v4193_v25 = vld [vmem:[#allocation4 + $0x28] sm:$0xff]  ;;  %v3139_v61 = vld [vmem:[#allocation10 + $0x78] sm:$0xf] }
  0x4a   :  { %382 = vmatmul.bf16.gmra.mxu0 %v4181_v62  ;;  %392 = vmatmul.bf16.gmra.mxu3 %v4183_v63 }
  0x4b   :  { %422 = vmatpush.bf16.msrb.mxu0 %v2876_v31  ;;  %520 = vmatpush.bf16.msrb.mxu3 %v2884_v2  ;;  %v2836_v31 = vor.u32 %v3662_v28, %v2833_v30  ;;  %v3759_v28 = vld [vmem:[#allocation10 + $0x110] sm:$0xf0] }
  0x4c   :  { %441 = vmatmul.bf16.gmra.mxu1 %v4183_v63  ;;  %3888 = vmatpush.bf16.msra.mxu2 %v2896_v21 }
  0x4f   :  { %423 = vmatpush.bf16.msrb.mxu0 %v2860_v37  ;;  %521 = vmatpush.bf16.msrb.mxu3 %v2868_v6  ;;  %v2832_v37 = vor.u32 %v3664_v36, %v2831_v35  ;;  %v4223_v6 = vperm.slane %v4214_v54, 0  ;;  %v3103_v35 = vld [vmem:[#allocation10 + $0x30] sm:$0xf]  ;;  %v3732_v36 = vld [vmem:[#allocation10 + $0x38] sm:$0xf0] }
  0x50   :  { %3889 = vmatpush.bf16.msra.mxu2 %v2880_v24 }
  0x53   :  { %424 = vmatpush.bf16.msrb.mxu0 %v2844_v43  ;;  %522 = vmatpush.bf16.msrb.mxu3 %v2852_v18  ;;  %v3439_v43 = vld [vmem:[#allocation10 + $0x2d0] sm:$0xf] }
  0x54   :  { %3890 = vmatpush.bf16.msra.mxu2 %v2864_v29  ;;  %v3440_v45 = vor.u32 %v3816_v44, %v3439_v43 }
  0x57   :  { %425 = vmatpush.bf16.msrb.mxu0 %v2828_v51  ;;  %523 = vmatpush.bf16.msrb.mxu3 %v2836_v31  ;;  %v3771_v51 = vld [vmem:[#allocation10 + $0x170] sm:$0xf0]  ;;  %v3212_v31 = vor.u32 %v3759_v28, %v3211_v27 }
  0x58   :  { %3891 = vmatpush.bf16.msra.mxu2 %v2848_v34  ;;  %v3260_v53 = vor.u32 %v3771_v51, %v3259_v48  ;;  %v3091_v48 = vld [vmem:[#allocation10 + $0x18] sm:$0xf]  ;;  %v3344_v51 = vor.u32 %v3792_v47, %v3343_v46 }
  0x5a   :  { %397 = vmatmul.bf16.gmra.mxu3 %v4188_v9  ;;  %426 = vmatmul.bf16.vlgmr.msrb.gmra.mxu0 %v4171_v50 }
  0x5b   :  { %467 = vmatpush.bf16.msra.mxu0 %v2944_v8  ;;  %1680 = vmatpush.bf16.msra.mxu3 %v3452_v42  ;;  %v3127_v8 = vld [vmem:[#allocation10 + $0x60] sm:$0xf]  ;;  %v3200_v42 = vor.u32 %v3756_v41, %v3199_v40 }
  0x5c   :  { %446 = vmatmul.bf16.gmra.mxu1 %v4188_v9  ;;  %3892 = vmatpush.bf16.msra.mxu2 %v2832_v37  ;;  %v3128_v11 = vor.u32 %v3738_v10, %v3127_v8  ;;  %v3319_v41 = vld [vmem:[#allocation10 + $0x1e0] sm:$0xf] }
  0x5d   :  { %1582 = vmatpush.bf16.msrb.mxu1 %v3260_v53  ;;  %v3729_v53 = vld [vmem:[#allocation10 + $0x20] sm:$0xf0] }
  0x5f   :  { %468 = vmatpush.bf16.msra.mxu0 %v2928_v12  ;;  %485 = vmatmul.bf16.vlgmr.msra.gmra.mxu2 %v4173_v52  ;;  %v3223_v12 = vld [vmem:[#allocation10 + $0x120] sm:$0xf] }
  0x60   :  { %1681 = vmatpush.bf16.msra.mxu3 %v3440_v45  ;;  %1631 = vmatpush.bf16.msrb.mxu2 %v3356_v19 }
  0x61   :  { %1583 = vmatpush.bf16.msrb.mxu1 %v3248_v59 }
  0x63   :  { %469 = vmatpush.bf16.msra.mxu0 %v2912_v16  ;;  %v3224_v16 = vor.u32 %v3762_v13, %v3223_v12  ;;  %v3415_v12 = vld [vmem:[#allocation10 + $0x2a0] sm:$0xf]  ;;  %v3810_v13 = vld [vmem:[#allocation10 + $0x2a8] sm:$0xf0] }
  0x64   :  { %1632 = vmatpush.bf16.msrb.mxu2 %v3344_v51 }
  0x65   :  { %1584 = vmatpush.bf16.msrb.mxu1 %v3236_v4  ;;  %v3175_v4 = vld [vmem:[#allocation10 + $0xc0] sm:$0xf] }
  0x67   :  { %470 = vmatpush.bf16.msra.mxu0 %v2896_v21  ;;  %v3427_v21 = vld [vmem:[#allocation10 + $0x2b8] sm:$0xf] }
  0x69   :  { %1585 = vmatpush.bf16.msrb.mxu1 %v3224_v16 }
  0x6a   :  { %402 = vmatmul.bf16.gmra.mxu3 %v4193_v25  ;;  %431 = vmatmul.bf16.gmra.mxu0 %v4181_v62 }
  0x6b   :  { %471 = vmatpush.bf16.msra.mxu0 %v2880_v24  ;;  %v3428_v24 = vor.u32 %v3813_v22, %v3427_v21  ;;  %v3789_v21 = vld [vmem:[#allocation10 + $0x200] sm:$0xf0] }
  0x6c   :  { %451 = vmatmul.bf16.gmra.mxu1 %v4193_v25 }
  0x6d   :  { %1682 = vmatpush.bf16.msra.mxu3 %v3428_v24  ;;  %1586 = vmatpush.bf16.msrb.mxu1 %v3212_v31 }
  0x6f   :  { %472 = vmatpush.bf16.msra.mxu0 %v2864_v29  ;;  %490 = vmatmul.bf16.gmra.mxu2 %v4183_v63 }
  0x71   :  { %1587 = vmatpush.bf16.msrb.mxu1 %v3200_v42  ;;  %v3786_v42 = vld [vmem:[#allocation10 + $0x1e8] sm:$0xf0] }
  0x72   :  { %v3320_v46 = vor.u32 %v3786_v42, %v3319_v41 }
  0x73   :  { %473 = vmatpush.bf16.msra.mxu0 %v2848_v34 }
  0x77   :  { %474 = vmatpush.bf16.msra.mxu0 %v2832_v37  ;;  %v3104_v37 = vor.u32 %v3732_v36, %v3103_v35  ;;  %v3403_v35 = vld [vmem:[#allocation10 + $0x288] sm:$0xf]  ;;  %v3807_v36 = vld [vmem:[#allocation10 + $0x290] sm:$0xf0] }
  0x78   :  { %v3404_v40 = vor.u32 %v3807_v36, %v3403_v35 }
  0x7a   :  { %407 = vmatmul.bf16.gmra.mxu3 %v4198_v38  ;;  %475 = vmatmul.bf16.vlgmr.msra.gmra.mxu0 %v4171_v50 }
  0x7b   :  { %1533 = vmatpush.bf16.msrb.mxu0 %v3164_v49 }
  0x7c   :  { %456 = vmatmul.bf16.gmra.mxu1 %v4198_v38 }
  0x7f   :  { %495 = vmatmul.bf16.gmra.mxu2 %v4188_v9 }
  0x8a   :  { %412 = vmatmul.bf16.gmra.mxu3 %v4204_v39  ;;  %480 = vmatmul.bf16.gmra.mxu0 %v4181_v62 }
  0x8c   :  { %461 = vmatmul.bf16.gmra.mxu1 %v4204_v39 }
  0x8f   :  { %500 = vmatmul.bf16.gmra.mxu2 %v4193_v25 }
  0x9a   :  { %524 = vmatmul.bf16.vlgmr.msrb.gmra.mxu3 %v4171_v50  ;;  %v3151_v50 = vld [vmem:[#allocation10 + $0x90] sm:$0xf] }
  0x9b   :  { %v3152_v57 = vor.u32 %v3744_v55, %v3151_v50  ;;  %v3187_v50 = vld [vmem:[#allocation10 + $0xd8] sm:$0xf]  ;;  %v3753_v55 = vld [vmem:[#allocation10 + $0xe0] sm:$0xf0] }
  0x9c   :  { %v3188_v58 = vor.u32 %v3753_v55, %v3187_v50 }
  0x9d   :  { %1534 = vmatpush.bf16.msrb.mxu0 %v3152_v57  ;;  %v3092_v57 = vor.u32 %v3729_v53, %v3091_v48 }
  0x9e   :  { %1588 = vmatpush.bf16.msrb.mxu1 %v3188_v58 }
  0x9f   :  { %505 = vmatmul.bf16.gmra.mxu2 %v4198_v38 }
  0xaa   :  { %529 = vmatmul.bf16.gmra.mxu3 %v4181_v62  ;;  %v3741_v62 = vld [vmem:[#allocation10 + $0x80] sm:$0xf0] }
  0xab   :  { %v3140_v2 = vor.u32 %v3741_v62, %v3139_v61 }
  0xad   :  { %1535 = vmatpush.bf16.msrb.mxu0 %v3140_v2  ;;  %v3726_v2 = vld [vmem:[#allocation10 + $0x8] sm:$0xf0] }
  0xae   :  { %v3080_v3 = vor.u32 %v3726_v2, %v3079_v0 }
  0xaf   :  { %510 = vmatmul.bf16.gmra.mxu2 %v4204_v39 }
  0xb1   :  { %1536 = vmatpush.bf16.msrb.mxu0 %v3128_v11 }
  0xb7   :  { %v4219_v1 = vpop.f32.mrf.mxu0 }
  0xb8   :  { %v379_v19 = vadd.f32 %v4219_v1, %v4223_v6 }
  0xb9   :  { %v437_v5 = vpop.f32.mrf.mxu1 }
  0xba   :  { %534 = vmatmul.bf16.gmra.mxu3 %v4173_v52  ;;  %v438_v7 = vadd.f32 %v437_v5, %v4217_v60  ;;  %v3115_v52 = vld [vmem:[#allocation10 + $0x48] sm:$0xf]  ;;  %v3750_v5 = vld [vmem:[#allocation10 + $0xc8] sm:$0xf0]  ;;  %v565_v28 = vmax.f32 %v379_v19, 0.0 }
  0xbb   :  { %v3116_v30 = vor.u32 %v3735_v26, %v3115_v52  ;;  %v3391_v19 = vld [vmem:[#allocation10 + $0x270] sm:$0xf] }
  0xbc   :  { %v582_v18 = vmax.f32 %v438_v7, 0.0  ;;  %v3176_v7 = vor.u32 %v3750_v5, %v3175_v4 }
  0xbd   :  { %v388_v17 = vpop.f32.mrf.mxu3  ;;  %1537 = vmatpush.bf16.msrb.mxu0 %v3116_v30 }
  0xbe   :  { %v389_v20 = vadd.f32 %v388_v17, %v4223_v6  ;;  %1589 = vmatpush.bf16.msrb.mxu1 %v3176_v7 }
  0xbf   :  { %v4228_v23 = vpop.f32.mrf.mxu0 }
  0xc0   :  { %v581_v29 = vmax.f32 %v389_v20, 0.0  ;;  %v3331_v20 = vld [vmem:[#allocation10 + $0x1f8] sm:$0xf] }
  0xc1   :  { %v439_v32 = vpop.f32.mrf.mxu1  ;;  %1538 = vmatpush.bf16.msrb.mxu0 %v3104_v37  ;;  %v3332_v52 = vor.u32 %v3789_v21, %v3331_v20 }
  0xc2   :  { %v637_v33 = vpack.c.bf16 %v582_v18, %v581_v29  ;;  %v440_v34 = vadd.f32 %v439_v32, %v4217_v60 }
  0xc3   :  { %1633 = vmatpush.bf16.msrb.mxu2 %v3332_v52  ;;  %v3804_v52 = vld [vmem:[#allocation10 + $0x278] sm:$0xf0] }
  0xc4   :  { %669 = vst [vmem:[#allocation2 + $0x40] sm:$0xff] %v637_v33  ;;  %v586_v44 = vmax.f32 %v440_v34, 0.0 }
  0xc5   :  { %v390_v43 = vpop.f32.mrf.mxu3  ;;  %1539 = vmatpush.bf16.msrb.mxu0 %v3092_v57 }
  0xc6   :  { %v391_v45 = vadd.f32 %v390_v43, %v4223_v6  ;;  %v381_v43 = vadd.f32 %v4228_v23, %v4223_v6 }
  0xc7   :  { %v4232_v49 = vpop.f32.mrf.mxu0  ;;  %1634 = vmatpush.bf16.msrb.mxu2 %v3320_v46 }
  0xc8   :  { %v585_v56 = vmax.f32 %v391_v45, 0.0  ;;  %v569_v53 = vmax.f32 %v381_v43, 0.0  ;;  %v384_v23 = vadd.f32 %v4232_v49, %v4223_v6 }
  0xc9   :  { %v442_v59 = vpop.f32.mrf.mxu1  ;;  %1540 = vmatpush.bf16.msrb.mxu0 %v3080_v3 }
  0xca   :  { %v639_v61 = vpack.c.bf16 %v586_v44, %v585_v56  ;;  %539 = vmatmul.bf16.gmra.mxu3 %v4183_v63  ;;  %v443_v62 = vadd.f32 %v442_v59, %v4217_v60  ;;  %v3416_v63 = vor.u32 %v3810_v13, %v3415_v12  ;;  %v573_v0 = vmax.f32 %v384_v23, 0.0  ;;  %v3307_v12 = vld [vmem:[#allocation10 + $0x1c8] sm:$0xf]  ;;  %v3783_v13 = vld [vmem:[#allocation10 + $0x1d0] sm:$0xf0] }
  0xcc   :  { %671 = vst [vmem:[#allocation2 + $0x50] sm:$0xff] %v639_v61  ;;  %v590_v11 = vmax.f32 %v443_v62, 0.0  ;;  %1683 = vmatpush.bf16.msra.mxu3 %v3416_v63 }
  0xcd   :  { %v393_v8 = vpop.f32.mrf.mxu3 }
  0xce   :  { %v394_v10 = vadd.f32 %v393_v8, %v4223_v6 }
  0xcf   :  { %v4238_v14 = vpop.f32.mrf.mxu0 }
  0xd0   :  { %v589_v15 = vmax.f32 %v394_v10, 0.0  ;;  %1684 = vmatpush.bf16.msra.mxu3 %v3404_v40  ;;  %v386_v63 = vadd.f32 %v4238_v14, %v4223_v6 }
  0xd1   :  { %v444_v16 = vpop.f32.mrf.mxu1 }
  0xd2   :  { %v641_v17 = vpack.c.bf16 %v590_v11, %v589_v15  ;;  %v445_v18 = vadd.f32 %v444_v16, %v4217_v60 }
  0xd4   :  { %673 = vst [vmem:[#allocation2 + $0x60] sm:$0xff] %v641_v17  ;;  %v594_v26 = vmax.f32 %v445_v18, 0.0  ;;  %v3308_v18 = vor.u32 %v3783_v13, %v3307_v12  ;;  %v2983_v12 = vld [vmem:[#allocation2 + $0x40] sm:$0xf]  ;;  %v2985_v13 = vld [vmem:[#allocation2 + $0x50] sm:$0xf0] }
  0xd5   :  { %v395_v22 = vpop.f32.mrf.mxu3 }
  0xd6   :  { %v396_v24 = vadd.f32 %v395_v22, %v4223_v6  ;;  %1635 = vmatpush.bf16.msrb.mxu2 %v3308_v18  ;;  %v3701_v18 = vld [vmem:[#allocation2 + $0x44] sm:$0xf] }
  0xd7   :  { %v427_v27 = vpop.f32.mrf.mxu0 }
  0xd8   :  { %v593_v29 = vmax.f32 %v396_v24, 0.0  ;;  %v428_v30 = vadd.f32 %v427_v27, %v4217_v60 }
  0xd9   :  { %v447_v31 = vpop.f32.mrf.mxu1 }
  0xda   :  { %v643_v32 = vpack.c.bf16 %v594_v26, %v593_v29  ;;  %v566_v33 = vmax.f32 %v428_v30, 0.0  ;;  %544 = vmatmul.bf16.gmra.mxu3 %v4188_v9  ;;  %v448_v1 = vadd.f32 %v447_v31, %v4217_v60  ;;  %v3392_v26 = vor.u32 %v3804_v52, %v3391_v19 }
  0xdb   :  { %v577_v29 = vmax.f32 %v386_v63, 0.0  ;;  %v3367_v63 = vld [vmem:[#allocation10 + $0x240] sm:$0xf] }
  0xdc   :  { %675 = vst [vmem:[#allocation2 + $0x70] sm:$0xff] %v643_v32  ;;  %v629_v34 = vpack.c.bf16 %v566_v33, %v565_v28  ;;  %v598_v45 = vmax.f32 %v448_v1, 0.0  ;;  %1685 = vmatpush.bf16.msra.mxu3 %v3392_v26  ;;  %v3295_v1 = vld [vmem:[#allocation10 + $0x1b0] sm:$0xf]  ;;  %v4286_v26 = vor.u32 %v3701_v18, %v2985_v13 }
  0xdd   :  { %v398_v37 = vpop.f32.mrf.mxu3 }
  0xde   :  { %661 = vst [vmem:[#allocation2] sm:$0xff] %v629_v34  ;;  %v399_v44 = vadd.f32 %v398_v37, %v4223_v6  ;;  %v3780_v34 = vld [vmem:[#allocation10 + $0x1b8] sm:$0xf0] }
  0xdf   :  { %v429_v47 = vpop.f32.mrf.mxu0  ;;  %v3296_v36 = vor.u32 %v3780_v34, %v3295_v1 }
  0xe0   :  { %v597_v9 = vmax.f32 %v399_v44, 0.0  ;;  %v430_v48 = vadd.f32 %v429_v47, %v4217_v60  ;;  %v3379_v47 = vld [vmem:[#allocation10 + $0x258] sm:$0xf] }
  0xe1   :  { %v449_v51 = vpop.f32.mrf.mxu1  ;;  %1636 = vmatpush.bf16.msrb.mxu2 %v3296_v36 }
  0xe2   :  { %v645_v50 = vpack.c.bf16 %v598_v45, %v597_v9  ;;  %v570_v55 = vmax.f32 %v430_v48, 0.0  ;;  %v450_v56 = vadd.f32 %v449_v51, %v4217_v60 }
  0xe4   :  { %677 = vst [vmem:[#allocation2 + $0x80] sm:$0xff] %v645_v50  ;;  %v631_v57 = vpack.c.bf16 %v570_v55, %v569_v53  ;;  %v602_v61 = vmax.f32 %v450_v56, 0.0  ;;  %v3801_v53 = vld [vmem:[#allocation10 + $0x260] sm:$0xf0] }
  0xe5   :  { %v400_v58 = vpop.f32.mrf.mxu3  ;;  %v2951_v49 = vld [vmem:[#allocation2] sm:$0xf]  ;;  %v3693_v10 = vld [vmem:[#allocation2 + $0x4] sm:$0xf] }
  0xe6   :  { %663 = vst [vmem:[#allocation2 + $0x10] sm:$0xff] %v631_v57  ;;  %v401_v59 = vadd.f32 %v400_v58, %v4223_v6  ;;  %v3380_v57 = vor.u32 %v3801_v53, %v3379_v47 }
  0xe7   :  { %v432_v62 = vpop.f32.mrf.mxu0 }
  0xe8   :  { %v601_v2 = vmax.f32 %v401_v59, 0.0  ;;  %v433_v3 = vadd.f32 %v432_v62, %v4217_v60  ;;  %1686 = vmatpush.bf16.msra.mxu3 %v3380_v57  ;;  %v3283_v62 = vld [vmem:[#allocation10 + $0x198] sm:$0xf] }
  0xe9   :  { %v452_v4 = vpop.f32.mrf.mxu1  ;;  %v3453_v57 = vld [vmem:[#allocation10 + $0x2f4] sm:$0xf0] }
  0xea   :  { %v647_v5 = vpack.c.bf16 %v602_v61, %v601_v2  ;;  %v574_v7 = vmax.f32 %v433_v3, 0.0  ;;  %549 = vmatmul.bf16.gmra.mxu3 %v4193_v25  ;;  %v453_v8 = vadd.f32 %v452_v4, %v4217_v60 }
  0xec   :  { %679 = vst [vmem:[#allocation2 + $0x90] sm:$0xff] %v647_v5  ;;  %v633_v11 = vpack.c.bf16 %v574_v7, %v573_v0  ;;  %v606_v25 = vmax.f32 %v453_v8, 0.0  ;;  %v3777_v0 = vld [vmem:[#allocation10 + $0x1a0] sm:$0xf0] }
  0xed   :  { %v403_v15 = vpop.f32.mrf.mxu3  ;;  %v3695_v16 = vld [vmem:[#allocation2 + $0xc] sm:$0xf0]  ;;  %v2953_v17 = vld [vmem:[#allocation2 + $0x10] sm:$0xf0]  ;;  %v3284_v3 = vor.u32 %v3777_v0, %v3283_v62 }
  0xee   :  { %665 = vst [vmem:[#allocation2 + $0x20] sm:$0xff] %v633_v11  ;;  %v404_v20 = vadd.f32 %v403_v15, %v4223_v6  ;;  %v4261_v21 = vor.u32 %v3695_v16, %v2951_v49  ;;  %v4263_v22 = vor.u32 %v3693_v10, %v2953_v17  ;;  %v3703_v11 = vld [vmem:[#allocation2 + $0x4c] sm:$0xf0] }
  0xef   :  { %v434_v24 = vpop.f32.mrf.mxu0  ;;  %1637 = vmatpush.bf16.msrb.mxu2 %v3284_v3  ;;  %v3798_v15 = vld [vmem:[#allocation10 + $0x248] sm:$0xf0]  ;;  %v4283_v17 = vor.u32 %v3703_v11, %v2983_v12  ;;  %v3015_v12 = vld [vmem:[#allocation2 + $0x80] sm:$0xf] }
  0xf0   :  { %v605_v27 = vmax.f32 %v404_v20, 0.0  ;;  %v435_v14 = vadd.f32 %v434_v24, %v4217_v60  ;;  %1541 = vmatmul.bf16.vlgmr.msrb.gmra.mxu0 %v4261_v21  ;;  %1590 = vmatmul.bf16.vlgmr.msrb.gmra.mxu1 %v4263_v22  ;;  %v3368_v19 = vor.u32 %v3798_v15, %v3367_v63  ;;  %v3271_v20 = vld [vmem:[#allocation10 + $0x180] sm:$0xf] }
  0xf1   :  { %v454_v28 = vpop.f32.mrf.mxu1  ;;  %v3709_v63 = vld [vmem:[#allocation2 + $0x84] sm:$0xf] }
  0xf2   :  { %v649_v30 = vpack.c.bf16 %v606_v25, %v605_v27  ;;  %v578_v31 = vmax.f32 %v435_v14, 0.0  ;;  %v455_v32 = vadd.f32 %v454_v28, %v4217_v60  ;;  %v3774_v25 = vld [vmem:[#allocation10 + $0x188] sm:$0xf0]  ;;  %1687 = vmatpush.bf16.msra.mxu3 %v3368_v19  ;;  %v3791_v19 = vld [vmem:[#allocation10 + $0x214] sm:$0xf] }
  0xf3   :  { %v3711_v13 = vld [vmem:[#allocation2 + $0x8c] sm:$0xf0]  ;;  %v3017_v15 = vld [vmem:[#allocation2 + $0x90] sm:$0xf0] }
  0xf4   :  { %681 = vst [vmem:[#allocation2 + $0xa0] sm:$0xff] %v649_v30  ;;  %v635_v33 = vpack.c.bf16 %v578_v31, %v577_v29  ;;  %v610_v40 = vmax.f32 %v455_v32, 0.0  ;;  %v4292_v31 = vperm.slane %v4214_v54, 2 }
  0xf5   :  { %v405_v35 = vpop.f32.mrf.mxu3  ;;  %v2967_v45 = vld [vmem:[#allocation2 + $0x20] sm:$0xf]  ;;  %v3697_v46 = vld [vmem:[#allocation2 + $0x24] sm:$0xf] }
  0xf6   :  { %667 = vst [vmem:[#allocation2 + $0x30] sm:$0xff] %v635_v33  ;;  %v406_v37 = vadd.f32 %v405_v35, %v4223_v6 }
  0xf7   :  { %v476_v30 = vpop.f32.mrf.mxu0 }
  0xf8   :  { %v609_v41 = vmax.f32 %v406_v37, 0.0  ;;  %v477_v35 = vadd.f32 %v476_v30, %v4292_v31  ;;  %v4297_v37 = vperm.slane %v4214_v54, 3 }
  0xf9   :  { %v457_v42 = vpop.f32.mrf.mxu1 }
  0xfa   :  { %v651_v43 = vpack.c.bf16 %v610_v40, %v609_v41  ;;  %554 = vmatmul.bf16.gmra.mxu3 %v4198_v38  ;;  %v458_v44 = vadd.f32 %v457_v42, %v4217_v60  ;;  %v2999_v40 = vld [vmem:[#allocation2 + $0x60] sm:$0xf]  ;;  %v3707_v41 = vld [vmem:[#allocation2 + $0x6c] sm:$0xf0]  ;;  %v3705_v42 = vld [vmem:[#allocation2 + $0x64] sm:$0xf] }
  0xfc   :  { %683 = vst [vmem:[#allocation2 + $0xb0] sm:$0xff] %v651_v43  ;;  %v614_v55 = vmax.f32 %v458_v44, 0.0  ;;  %v567_v43 = vmax.f32 %v477_v35, 0.0  ;;  %v3794_v44 = vld [vmem:[#allocation10 + $0x22c] sm:$0xf] }
  0xfd   :  { %v408_v9 = vpop.f32.mrf.mxu3  ;;  %v3699_v48 = vld [vmem:[#allocation2 + $0x2c] sm:$0xf0]  ;;  %v2969_v51 = vld [vmem:[#allocation2 + $0x30] sm:$0xf0] }
  0xfe   :  { %v409_v50 = vadd.f32 %v408_v9, %v4223_v6  ;;  %v4273_v56 = vor.u32 %v3699_v48, %v2967_v45  ;;  %v4275_v23 = vor.u32 %v3697_v46, %v2969_v51  ;;  %v3357_v45 = vld [vmem:[#allocation10 + $0x234] sm:$0xf0]  ;;  %v3818_v51 = vld [vmem:[#allocation10 + $0x2ec] sm:$0xf] }
  0xff   :  { %v478_v46 = vpop.f32.mrf.mxu0  ;;  %v3360_v9 = vor.u32 %v3794_v44, %v3357_v45  ;;  %v3165_v48 = vld [vmem:[#allocation10 + $0xb4] sm:$0xf0] }
 0x100   :  { %v613_v58 = vmax.f32 %v409_v50, 0.0  ;;  %1546 = vmatmul.bf16.gmra.mxu0 %v4273_v56  ;;  %1595 = vmatmul.bf16.gmra.mxu1 %v4275_v23  ;;  %v4300_v50 = vor.u32 %v3707_v41, %v2999_v40  ;;  %v479_v3 = vadd.f32 %v478_v46, %v4292_v31 }
 0x101   :  { %v459_v38 = vpop.f32.mrf.mxu1 }
 0x102   :  { %v653_v59 = vpack.c.bf16 %v614_v55, %v613_v58  ;;  %v460_v61 = vadd.f32 %v459_v38, %v4217_v60  ;;  %v3770_v58 = vld [vmem:[#allocation10 + $0x16c] sm:$0xf]  ;;  %v3261_v38 = vld [vmem:[#allocation10 + $0x174] sm:$0xf0] }
 0x104   :  { %685 = vst [vmem:[#allocation2 + $0xc0] sm:$0xff] %v653_v59  ;;  %v618_v5 = vmax.f32 %v460_v61, 0.0  ;;  %v3456_v59 = vor.u32 %v3818_v51, %v3453_v57  ;;  %v3264_v61 = vor.u32 %v3770_v58, %v3261_v38  ;;  %v3740_v51 = vld [vmem:[#allocation10 + $0x7c] sm:$0xf] }
 0x105   :  { %v410_v2 = vpop.f32.mrf.mxu3  ;;  %v3764_v38 = vld [vmem:[#allocation10 + $0x13c] sm:$0xf] }
 0x106   :  { %v411_v4 = vadd.f32 %v410_v2, %v4223_v6  ;;  %1876 = vmatpush.bf16.msrb.mxu3 %v3456_v59  ;;  %v4306_v2 = vpop.f32.mrf.mxu2  ;;  %1778 = vmatpush.bf16.msra.mxu1 %v3264_v61  ;;  %v3237_v59 = vld [vmem:[#allocation10 + $0x144] sm:$0xf0] }
 0x107   :  { %v3240_v61 = vor.u32 %v3764_v38, %v3237_v59 }
 0x108   :  { %v617_v7 = vmax.f32 %v411_v4, 0.0 }
 0x109   :  { %v462_v8 = vpop.f32.mrf.mxu1 }
 0x10a   :  { %v655_v49 = vpack.c.bf16 %v618_v5, %v617_v7  ;;  %559 = vmatmul.bf16.gmra.mxu3 %v4204_v39  ;;  %v463_v10 = vadd.f32 %v462_v8, %v4217_v60  ;;  %v3272_v39 = vor.u32 %v3774_v25, %v3271_v20  ;;  %v481_v7 = vpop.f32.mrf.mxu0  ;;  %v571_v8 = vmax.f32 %v479_v3, 0.0  ;;  %v3345_v20 = vld [vmem:[#allocation10 + $0x21c] sm:$0xf0]  ;;  %v3715_v3 = vld [vmem:[#allocation2 + $0xac] sm:$0xf0] }
 0x10c   :  { %687 = vst [vmem:[#allocation2 + $0xd0] sm:$0xff] %v655_v49  ;;  %v622_v24 = vmax.f32 %v463_v10, 0.0  ;;  %1638 = vmatpush.bf16.msrb.mxu2 %v3272_v39  ;;  %v482_v49 = vadd.f32 %v481_v7, %v4292_v31  ;;  %v3153_v39 = vld [vmem:[#allocation10 + $0x9c] sm:$0xf0] }
 0x10d   :  { %v413_v16 = vpop.f32.mrf.mxu3  ;;  %v3713_v7 = vld [vmem:[#allocation2 + $0xa4] sm:$0xf] }
 0x10e   :  { %v414_v52 = vadd.f32 %v413_v16, %v4223_v6  ;;  %v575_v16 = vmax.f32 %v482_v49, 0.0  ;;  %v4311_v18 = vpop.f32.mrf.mxu2  ;;  %v3788_v49 = vld [vmem:[#allocation10 + $0x1fc] sm:$0xf] }
 0x110   :  { %v621_v27 = vmax.f32 %v414_v52, 0.0  ;;  %1551 = vmatmul.bf16.gmra.mxu0 %v4283_v17  ;;  %1600 = vmatmul.bf16.gmra.mxu1 %v4286_v26  ;;  %v3348_v52 = vor.u32 %v3791_v19, %v3345_v20 }
 0x111   :  { %v464_v14 = vpop.f32.mrf.mxu1  ;;  %1827 = vmatpush.bf16.msra.mxu2 %v3360_v9 }
 0x112   :  { %v657_v28 = vpack.c.bf16 %v622_v24, %v621_v27  ;;  %v465_v29 = vadd.f32 %v464_v14, %v4217_v60  ;;  %v3001_v60 = vld [vmem:[#allocation2 + $0x70] sm:$0xf0]  ;;  %v3743_v24 = vld [vmem:[#allocation10 + $0x94] sm:$0xf]  ;;  %v483_v40 = vpop.f32.mrf.mxu0 }
 0x113   :  { %v4302_v54 = vor.u32 %v3705_v42, %v3001_v60  ;;  %v3815_v27 = vld [vmem:[#allocation10 + $0x2d4] sm:$0xf]  ;;  %v3156_v30 = vor.u32 %v3743_v24, %v3153_v39  ;;  %v484_v45 = vadd.f32 %v483_v40, %v4292_v31  ;;  %v3761_v24 = vld [vmem:[#allocation10 + $0x124] sm:$0xf]  ;;  %v3225_v39 = vld [vmem:[#allocation10 + $0x12c] sm:$0xf0] }
 0x114   :  { %689 = vst [vmem:[#allocation2 + $0xe0] sm:$0xff] %v657_v28  ;;  %v626_v1 = vmax.f32 %v465_v29, 0.0  ;;  %v4314_v28 = vor.u32 %v3711_v13, %v3015_v12  ;;  %v4316_v29 = vor.u32 %v3709_v63, %v3017_v15  ;;  %v3812_v15 = vld [vmem:[#allocation10 + $0x2bc] sm:$0xf] }
 0x115   :  { %v415_v32 = vpop.f32.mrf.mxu3  ;;  %1828 = vmatpush.bf16.msra.mxu2 %v3348_v52 }
 0x116   :  { %v416_v33 = vadd.f32 %v415_v32, %v4223_v6  ;;  %v3746_v6 = vld [vmem:[#allocation10 + $0xac] sm:$0xf]  ;;  %v3441_v32 = vld [vmem:[#allocation10 + $0x2dc] sm:$0xf0] }
 0x117   :  { %v3168_v55 = vor.u32 %v3746_v6, %v3165_v48  ;;  %v4328_v48 = vpop.f32.mrf.mxu2 }
 0x118   :  { %v625_v34 = vmax.f32 %v416_v33, 0.0  ;;  %v3767_v33 = vld [vmem:[#allocation10 + $0x154] sm:$0xf] }
 0x119   :  { %1729 = vmatpush.bf16.msra.mxu0 %v3168_v55  ;;  %v579_v55 = vmax.f32 %v484_v45, 0.0  ;;  %v489_v45 = vadd.f32 %v4311_v18, %v4292_v31  ;;  %v3728_v18 = vld [vmem:[#allocation10 + $0x1c] sm:$0xf] }
 0x11a   :  { %v659_v36 = vpack.c.bf16 %v626_v1, %v625_v34  ;;  %v3249_v1 = vld [vmem:[#allocation10 + $0x15c] sm:$0xf0]  ;;  %v3444_v34 = vor.u32 %v3815_v27, %v3441_v32  ;;  %v3228_v27 = vor.u32 %v3761_v24, %v3225_v39  ;;  %v3809_v39 = vld [vmem:[#allocation10 + $0x2a4] sm:$0xf] }
 0x11b   :  { %v3252_v35 = vor.u32 %v3767_v33, %v3249_v1  ;;  %v3758_v1 = vld [vmem:[#allocation10 + $0x10c] sm:$0xf] }
 0x11c   :  { %691 = vst [vmem:[#allocation2 + $0xf0] sm:$0xff] %v659_v36  ;;  %1877 = vmatpush.bf16.msrb.mxu3 %v3444_v34  ;;  %v3213_v34 = vld [vmem:[#allocation10 + $0x114] sm:$0xf0] }
 0x11d   :  { %v525_v47 = vpop.f32.mrf.mxu3  ;;  %1730 = vmatpush.bf16.msra.mxu0 %v3156_v30  ;;  %1779 = vmatpush.bf16.msra.mxu1 %v3252_v35  ;;  %v3117_v30 = vld [vmem:[#allocation10 + $0x54] sm:$0xf0] }
 0x11e   :  { %v526_v53 = vadd.f32 %v525_v47, %v4297_v37 }
 0x11f   :  { %v4339_v33 = vpop.f32.mrf.mxu2 }
 0x120   :  { %v568_v62 = vmax.f32 %v526_v53, 0.0  ;;  %1556 = vmatmul.bf16.gmra.mxu0 %v4300_v50  ;;  %1605 = vmatmul.bf16.gmra.mxu1 %v4302_v54  ;;  %v3141_v53 = vld [vmem:[#allocation10 + $0x84] sm:$0xf0] }
 0x121   :  { %v3144_v58 = vor.u32 %v3740_v51, %v3141_v53  ;;  %1780 = vmatpush.bf16.msra.mxu1 %v3240_v61  ;;  %v3105_v51 = vld [vmem:[#allocation10 + $0x3c] sm:$0xf0]  ;;  %v3755_v53 = vld [vmem:[#allocation10 + $0xf4] sm:$0xf]  ;;  %v3093_v61 = vld [vmem:[#allocation10 + $0x24] sm:$0xf0] }
 0x122   :  { %v630_v0 = vpack.c.bf16 %v568_v62, %v567_v43  ;;  %v487_v62 = vadd.f32 %v4306_v2, %v4292_v31  ;;  %v3129_v2 = vld [vmem:[#allocation10 + $0x6c] sm:$0xf0] }
 0x123   :  { %1731 = vmatpush.bf16.msra.mxu0 %v3144_v58  ;;  %v3201_v58 = vld [vmem:[#allocation10 + $0xfc] sm:$0xf0] }
 0x124   :  { %662 = vst [vmem:[#allocation2 + $0x8] sm:$0xff] %v630_v0  ;;  %v583_v19 = vmax.f32 %v487_v62, 0.0  ;;  %v3204_v59 = vor.u32 %v3755_v53, %v3201_v58  ;;  %v587_v62 = vmax.f32 %v489_v45, 0.0 }
 0x125   :  { %v527_v4 = vpop.f32.mrf.mxu3  ;;  %1781 = vmatpush.bf16.msra.mxu1 %v3228_v27  ;;  %v3417_v27 = vld [vmem:[#allocation10 + $0x2ac] sm:$0xf0] }
 0x126   :  { %v528_v5 = vadd.f32 %v527_v4, %v4297_v37  ;;  %v3033_v4 = vld [vmem:[#allocation2 + $0xb0] sm:$0xf0] }
 0x127   :  { %v4334_v13 = vor.u32 %v3713_v7, %v3033_v4  ;;  %v3189_v4 = vld [vmem:[#allocation10 + $0xe4] sm:$0xf0]  ;;  %v492_v7 = vadd.f32 %v4328_v48, %v4292_v31 }
 0x128   :  { %v572_v10 = vmax.f32 %v528_v5, 0.0  ;;  %v3031_v5 = vld [vmem:[#allocation2 + $0xa0] sm:$0xf] }
 0x129   :  { %v4332_v12 = vor.u32 %v3715_v3, %v3031_v5  ;;  %v3752_v3 = vld [vmem:[#allocation10 + $0xdc] sm:$0xf]  ;;  %v3096_v5 = vor.u32 %v3728_v18, %v3093_v61  ;;  %v591_v48 = vmax.f32 %v492_v7, 0.0 }
 0x12a   :  { %v632_v11 = vpack.c.bf16 %v572_v10, %v571_v8  ;;  %v3737_v8 = vld [vmem:[#allocation10 + $0x64] sm:$0xf]  ;;  %v3333_v10 = vld [vmem:[#allocation10 + $0x204] sm:$0xf0] }
 0x12b   :  { %v2959_v42 = vld [vmem:[#allocation2 + $0x8] sm:$0xf]  ;;  %v3694_v43 = vld [vmem:[#allocation2 + $0xc] sm:$0xf]  ;;  %v3336_v63 = vor.u32 %v3788_v49, %v3333_v10  ;;  %v3132_v52 = vor.u32 %v3737_v8, %v3129_v2  ;;  %v3719_v49 = vld [vmem:[#allocation2 + $0xcc] sm:$0xf0]  ;;  %v496_v10 = vpop.f32.mrf.mxu2 }
 0x12c   :  { %664 = vst [vmem:[#allocation2 + $0x18] sm:$0xff] %v632_v11  ;;  %v3785_v2 = vld [vmem:[#allocation10 + $0x1e4] sm:$0xf]  ;;  %v497_v61 = vadd.f32 %v496_v10, %v4292_v31 }
 0x12d   :  { %v530_v25 = vpop.f32.mrf.mxu3  ;;  %1829 = vmatpush.bf16.msra.mxu2 %v3336_v63  ;;  %1732 = vmatpush.bf16.msra.mxu0 %v3132_v52  ;;  %v3049_v63 = vld [vmem:[#allocation2 + $0xd0] sm:$0xf0]  ;;  %v3717_v52 = vld [vmem:[#allocation2 + $0xc4] sm:$0xf] }
 0x12e   :  { %v531_v14 = vadd.f32 %v530_v25, %v4297_v37 }
 0x130   :  { %v576_v36 = vmax.f32 %v531_v14, 0.0  ;;  %1561 = vmatmul.bf16.gmra.mxu0 %v4314_v28  ;;  %1610 = vmatmul.bf16.gmra.mxu1 %v4316_v29  ;;  %v3734_v14 = vld [vmem:[#allocation10 + $0x4c] sm:$0xf] }
 0x131   :  { %v3120_v35 = vor.u32 %v3734_v14, %v3117_v30  ;;  %v4355_v30 = vor.u32 %v3717_v52, %v3049_v63  ;;  %v3806_v63 = vld [vmem:[#allocation10 + $0x28c] sm:$0xf] }
 0x132   :  { %v634_v41 = vpack.c.bf16 %v576_v36, %v575_v16  ;;  %v3429_v16 = vld [vmem:[#allocation10 + $0x2c4] sm:$0xf0] }
 0x133   :  { %v3696_v60 = vld [vmem:[#allocation2 + $0x14] sm:$0xf0]  ;;  %v2961_v44 = vld [vmem:[#allocation2 + $0x18] sm:$0xf0]  ;;  %v3432_v25 = vor.u32 %v3812_v15, %v3429_v16  ;;  %1733 = vmatpush.bf16.msra.mxu0 %v3120_v35  ;;  %v3192_v15 = vor.u32 %v3752_v3, %v3189_v4  ;;  %v3725_v16 = vld [vmem:[#allocation10 + $0x4] sm:$0xf] }
 0x134   :  { %666 = vst [vmem:[#allocation2 + $0x28] sm:$0xff] %v634_v41  ;;  %v4321_v46 = vor.u32 %v3696_v60, %v2959_v42  ;;  %v4323_v47 = vor.u32 %v3694_v43, %v2961_v44  ;;  %v3216_v43 = vor.u32 %v3758_v1, %v3213_v34  ;;  %v3731_v44 = vld [vmem:[#allocation10 + $0x34] sm:$0xf]  ;;  %v3081_v1 = vld [vmem:[#allocation10 + $0xc] sm:$0xf0] }
 0x135   :  { %v532_v9 = vpop.f32.mrf.mxu3  ;;  %1878 = vmatpush.bf16.msrb.mxu3 %v3432_v25  ;;  %v3749_v34 = vld [vmem:[#allocation10 + $0xc4] sm:$0xf]  ;;  %v3084_v35 = vor.u32 %v3725_v16, %v3081_v1  ;;  %v3065_v3 = vld [vmem:[#allocation2 + $0xf0] sm:$0xf0]  ;;  %v3782_v4 = vld [vmem:[#allocation10 + $0x1cc] sm:$0xf] }
 0x136   :  { %4790 = vst [vmem:[#allocation18_spill] sm:$0xff] %v4323_v47  ;;  %v533_v6 = vadd.f32 %v532_v9, %v4297_v37  ;;  %1639 = vmatmul.bf16.vlgmr.msrb.gmra.mxu2 %v4321_v46  ;;  %1688 = vmatmul.bf16.vlgmr.msra.gmra.mxu3 %v4323_v47  ;;  %v599_v16 = vmax.f32 %v497_v61, 0.0  ;;  %v3393_v61 = vld [vmem:[#allocation10 + $0x27c] sm:$0xf0] }
 0x137   :  { %1782 = vmatpush.bf16.msra.mxu1 %v3216_v43 }
 0x138   :  { %v580_v57 = vmax.f32 %v533_v6, 0.0 }
 0x13a   :  { %v636_v0 = vpack.c.bf16 %v580_v57, %v579_v55  ;;  %v3108_v57 = vor.u32 %v3731_v44, %v3105_v51  ;;  %v494_v51 = vadd.f32 %v4339_v33, %v4292_v31  ;;  %v3063_v33 = vld [vmem:[#allocation2 + $0xe0] sm:$0xf] }
 0x13b   :  { %v2975_v40 = vld [vmem:[#allocation2 + $0x28] sm:$0xf]  ;;  %v3698_v41 = vld [vmem:[#allocation2 + $0x2c] sm:$0xf]  ;;  %1783 = vmatpush.bf16.msra.mxu1 %v3204_v59 }
 0x13c   :  { %668 = vst [vmem:[#allocation2 + $0x38] sm:$0xff] %v636_v0  ;;  %1734 = vmatpush.bf16.msra.mxu0 %v3108_v57  ;;  %v498_v57 = vpop.f32.mrf.mxu2  ;;  %v595_v59 = vmax.f32 %v494_v51, 0.0  ;;  %v3779_v51 = vld [vmem:[#allocation10 + $0x1b4] sm:$0xf] }
 0x13d   :  { %v535_v11 = vpop.f32.mrf.mxu3 }
 0x13e   :  { %v536_v20 = vadd.f32 %v535_v11, %v4297_v37  ;;  %v3047_v11 = vld [vmem:[#allocation2 + $0xc0] sm:$0xf] }
 0x13f   :  { %v4352_v25 = vor.u32 %v3719_v49, %v3047_v11  ;;  %1784 = vmatpush.bf16.msra.mxu1 %v3192_v15  ;;  %v3721_v49 = vld [vmem:[#allocation2 + $0xe4] sm:$0xf]  ;;  %v3405_v15 = vld [vmem:[#allocation10 + $0x294] sm:$0xf0] }
 0x140   :  { %v584_v32 = vmax.f32 %v536_v20, 0.0  ;;  %1566 = vmatmul.bf16.gmra.mxu0 %v4332_v12  ;;  %1615 = vmatmul.bf16.gmra.mxu1 %v4334_v13 }
 0x141   :  { %1735 = vmatpush.bf16.msra.mxu0 %v3096_v5  ;;  %v3309_v5 = vld [vmem:[#allocation10 + $0x1d4] sm:$0xf0] }
 0x142   :  { %v638_v36 = vpack.c.bf16 %v584_v32, %v583_v19  ;;  %v3321_v19 = vld [vmem:[#allocation10 + $0x1ec] sm:$0xf0]  ;;  %v3420_v32 = vor.u32 %v3809_v39, %v3417_v27  ;;  %v3312_v11 = vor.u32 %v3782_v4, %v3309_v5 }
 0x143   :  { %v3700_v42 = vld [vmem:[#allocation2 + $0x34] sm:$0xf0]  ;;  %v2977_v60 = vld [vmem:[#allocation2 + $0x38] sm:$0xf0]  ;;  %v3324_v24 = vor.u32 %v3785_v2, %v3321_v19  ;;  %v4372_v19 = vor.u32 %v3721_v49, %v3065_v3 }
 0x144   :  { %670 = vst [vmem:[#allocation2 + $0x48] sm:$0xff] %v638_v36  ;;  %v4343_v9 = vor.u32 %v3700_v42, %v2975_v40  ;;  %v4345_v6 = vor.u32 %v3698_v41, %v2977_v60  ;;  %v3177_v36 = vld [vmem:[#allocation10 + $0xcc] sm:$0xf0]  ;;  %1879 = vmatpush.bf16.msrb.mxu3 %v3420_v32  ;;  %v501_v10 = vpop.f32.mrf.mxu2  ;;  %v499_v32 = vadd.f32 %v498_v57, %v4292_v31  ;;  %v3297_v57 = vld [vmem:[#allocation10 + $0x1bc] sm:$0xf0] }
 0x145   :  { %v537_v55 = vpop.f32.mrf.mxu3  ;;  %1830 = vmatpush.bf16.msra.mxu2 %v3324_v24  ;;  %v3180_v41 = vor.u32 %v3749_v34, %v3177_v36  ;;  %1736 = vmatpush.bf16.msra.mxu0 %v3084_v35 }
 0x146   :  { %4791 = vst [vmem:[#allocation19_spill] sm:$0xff] %v4343_v9  ;;  %v538_v38 = vadd.f32 %v537_v55, %v4297_v37  ;;  %1644 = vmatmul.bf16.gmra.mxu2 %v4343_v9  ;;  %1693 = vmatmul.bf16.gmra.mxu3 %v4345_v6 }
 0x147   :  { %4792 = vst [vmem:[#allocation20_spill] sm:$0xff] %v4345_v6  ;;  %1785 = vmatpush.bf16.msra.mxu1 %v3180_v41  ;;  %v603_v41 = vmax.f32 %v499_v32, 0.0 }
 0x148   :  { %v588_v0 = vmax.f32 %v538_v38, 0.0 }
 0x149   :  { %1831 = vmatpush.bf16.msra.mxu2 %v3312_v11 }
 0x14a   :  { %v640_v8 = vpack.c.bf16 %v588_v0, %v587_v62  ;;  %v3723_v0 = vld [vmem:[#allocation2 + $0xec] sm:$0xf0] }
 0x14b   :  { %v2991_v60 = vld [vmem:[#allocation2 + $0x48] sm:$0xf]  ;;  %v3702_v44 = vld [vmem:[#allocation2 + $0x4c] sm:$0xf] }
 0x14c   :  { %672 = vst [vmem:[#allocation2 + $0x58] sm:$0xff] %v640_v8  ;;  %v4369_v8 = vor.u32 %v3723_v0, %v3063_v33 }
 0x14d   :  { %v540_v20 = vpop.f32.mrf.mxu3 }
 0x14e   :  { %v541_v14 = vadd.f32 %v540_v20, %v4297_v37  ;;  %v3408_v20 = vor.u32 %v3806_v63, %v3405_v15 }
 0x150   :  { %v592_v40 = vmax.f32 %v541_v14, 0.0  ;;  %1571 = vmatmul.bf16.gmra.mxu0 %v4352_v25  ;;  %1620 = vmatmul.bf16.gmra.mxu1 %v4355_v30 }
 0x151   :  { %1880 = vmatpush.bf16.msrb.mxu3 %v3408_v20 }
 0x152   :  { %v642_v42 = vpack.c.bf16 %v592_v40, %v591_v48  ;;  %v4387_v40 = vld [vmem:[%s4783_s4] sm:$0x7] }
 0x153   :  { %v3704_v43 = vld [vmem:[#allocation2 + $0x54] sm:$0xf0]  ;;  %v2993_v45 = vld [vmem:[#allocation2 + $0x58] sm:$0xf0] }
 0x154   :  { %674 = vst [vmem:[#allocation2 + $0x68] sm:$0xff] %v642_v42  ;;  %v4361_v53 = vor.u32 %v3704_v43, %v2991_v60  ;;  %v4363_v55 = vor.u32 %v3702_v44, %v2993_v45  ;;  %v503_v60 = vpop.f32.mrf.mxu2  ;;  %v502_v43 = vadd.f32 %v501_v10, %v4292_v31  ;;  %v4391_v45 = vperm.slane %v4387_v40, 0 }
 0x155   :  { %v542_v58 = vpop.f32.mrf.mxu3  ;;  %v504_v10 = vadd.f32 %v503_v60, %v4292_v31 }
 0x156   :  { %v543_v38 = vadd.f32 %v542_v58, %v4297_v37  ;;  %1649 = vmatmul.bf16.gmra.mxu2 %v4361_v53  ;;  %1698 = vmatmul.bf16.gmra.mxu3 %v4363_v55 }
 0x157   :  { %v611_v32 = vmax.f32 %v504_v10, 0.0 }
 0x158   :  { %v596_v18 = vmax.f32 %v543_v38, 0.0 }
 0x15a   :  { %v644_v62 = vpack.c.bf16 %v596_v18, %v595_v59  ;;  %v3300_v59 = vor.u32 %v3779_v51, %v3297_v57  ;;  %v3803_v18 = vld [vmem:[#allocation10 + $0x274] sm:$0xf] }
 0x15b   :  { %v3007_v39 = vld [vmem:[#allocation2 + $0x68] sm:$0xf]  ;;  %v3706_v48 = vld [vmem:[#allocation2 + $0x6c] sm:$0xf]  ;;  %v3396_v4 = vor.u32 %v3803_v18, %v3393_v61 }
 0x15c   :  { %676 = vst [vmem:[#allocation2 + $0x78] sm:$0xff] %v644_v62  ;;  %v607_v62 = vmax.f32 %v502_v43, 0.0  ;;  %1832 = vmatpush.bf16.msra.mxu2 %v3300_v59  ;;  %v506_v11 = vpop.f32.mrf.mxu2  ;;  %v3776_v43 = vld [vmem:[#allocation10 + $0x19c] sm:$0xf]  ;;  %v3381_v59 = vld [vmem:[#allocation10 + $0x264] sm:$0xf0] }
 0x15d   :  { %v545_v7 = vpop.f32.mrf.mxu3  ;;  %1881 = vmatpush.bf16.msrb.mxu3 %v3396_v4 }
 0x15e   :  { %v546_v2 = vadd.f32 %v545_v7, %v4297_v37 }
 0x160   :  { %v600_v52 = vmax.f32 %v546_v2, 0.0  ;;  %1576 = vmatmul.bf16.gmra.mxu0 %v4369_v8  ;;  %1625 = vmatmul.bf16.gmra.mxu1 %v4372_v19 }
 0x162   :  { %v646_v24 = vpack.c.bf16 %v600_v52, %v599_v16 }
 0x163   :  { %v3708_v27 = vld [vmem:[#allocation2 + $0x74] sm:$0xf0]  ;;  %v3009_v14 = vld [vmem:[#allocation2 + $0x78] sm:$0xf0] }
 0x164   :  { %678 = vst [vmem:[#allocation2 + $0x88] sm:$0xff] %v646_v24  ;;  %v4377_v1 = vor.u32 %v3708_v27, %v3007_v39  ;;  %v4379_v34 = vor.u32 %v3706_v48, %v3009_v14  ;;  %v508_v60 = vpop.f32.mrf.mxu2 }
 0x165   :  { %v547_v35 = vpop.f32.mrf.mxu3 }
 0x166   :  { %v548_v36 = vadd.f32 %v547_v35, %v4297_v37  ;;  %1654 = vmatmul.bf16.gmra.mxu2 %v4377_v1  ;;  %1703 = vmatmul.bf16.gmra.mxu3 %v4379_v34 }
 0x168   :  { %v604_v42 = vmax.f32 %v548_v36, 0.0 }
 0x16a   :  { %v648_v44 = vpack.c.bf16 %v604_v42, %v603_v41  ;;  %v507_v41 = vadd.f32 %v506_v11, %v4292_v31 }
 0x16b   :  { %v3023_v63 = vld [vmem:[#allocation2 + $0x88] sm:$0xf]  ;;  %v3710_v16 = vld [vmem:[#allocation2 + $0x8c] sm:$0xf] }
 0x16c   :  { %680 = vst [vmem:[#allocation2 + $0x98] sm:$0xff] %v648_v44  ;;  %v3285_v44 = vld [vmem:[#allocation10 + $0x1a4] sm:$0xf0]  ;;  %v615_v18 = vmax.f32 %v507_v41, 0.0 }
 0x16d   :  { %v550_v58 = vpop.f32.mrf.mxu3  ;;  %v1542_v38 = vpop.f32.mrf.mxu0 }
 0x16e   :  { %v551_v0 = vadd.f32 %v550_v58, %v4297_v37  ;;  %v1543_v33 = vadd.f32 %v1542_v38, %v4391_v45  ;;  %v1591_v3 = vpop.f32.mrf.mxu1  ;;  %v3288_v58 = vor.u32 %v3776_v43, %v3285_v44  ;;  %v3800_v38 = vld [vmem:[#allocation10 + $0x25c] sm:$0xf]  ;;  %v3273_v43 = vld [vmem:[#allocation10 + $0x18c] sm:$0xf0] }
 0x170   :  { %v608_v5 = vmax.f32 %v551_v0, 0.0  ;;  %v4395_v7 = vadd.f32 %v1591_v3, %v1543_v33  ;;  %1737 = vmatmul.bf16.vlgmr.msra.gmra.mxu0 %v4261_v21  ;;  %1786 = vmatmul.bf16.vlgmr.msra.gmra.mxu1 %v4263_v22  ;;  %v3384_v33 = vor.u32 %v3800_v38, %v3381_v59 }
 0x171   :  { %1833 = vmatpush.bf16.msra.mxu2 %v3288_v58 }
 0x172   :  { %v650_v49 = vpack.c.bf16 %v608_v5, %v607_v62  ;;  %1882 = vmatpush.bf16.msrb.mxu3 %v3384_v33 }
 0x173   :  { %v3712_v15 = vld [vmem:[#allocation2 + $0x94] sm:$0xf0]  ;;  %v3025_v2 = vld [vmem:[#allocation2 + $0x98] sm:$0xf0] }
 0x174   :  { %682 = vst [vmem:[#allocation2 + $0xa8] sm:$0xff] %v650_v49  ;;  %v4400_v20 = vor.u32 %v3712_v15, %v3023_v63  ;;  %v4402_v52 = vor.u32 %v3710_v16, %v3025_v2  ;;  %v509_v16 = vadd.f32 %v508_v60, %v4292_v31  ;;  %v3773_v60 = vld [vmem:[#allocation10 + $0x184] sm:$0xf] }
 0x175   :  { %v552_v24 = vpop.f32.mrf.mxu3  ;;  %v1544_v39 = vpop.f32.mrf.mxu0  ;;  %v3276_v44 = vor.u32 %v3773_v60, %v3273_v43 }
 0x176   :  { %v553_v27 = vadd.f32 %v552_v24, %v4297_v37  ;;  %v1545_v48 = vadd.f32 %v1544_v39, %v4391_v45  ;;  %v1593_v14 = vpop.f32.mrf.mxu1  ;;  %1659 = vmatmul.bf16.gmra.mxu2 %v4400_v20  ;;  %1708 = vmatmul.bf16.gmra.mxu3 %v4402_v52 }
 0x177   :  { %1834 = vmatpush.bf16.msra.mxu2 %v3276_v44 }
 0x178   :  { %v612_v35 = vmax.f32 %v553_v27, 0.0  ;;  %v4408_v36 = vadd.f32 %v1593_v14, %v1545_v48 }
 0x17a   :  { %v652_v42 = vpack.c.bf16 %v612_v35, %v611_v32  ;;  %v511_v32 = vpop.f32.mrf.mxu2  ;;  %v619_v35 = vmax.f32 %v509_v16, 0.0 }
 0x17b   :  { %v3039_v49 = vld [vmem:[#allocation2 + $0xa8] sm:$0xf]  ;;  %v3714_v63 = vld [vmem:[#allocation2 + $0xac] sm:$0xf]  ;;  %v512_v58 = vadd.f32 %v511_v32, %v4292_v31 }
 0x17c   :  { %684 = vst [vmem:[#allocation2 + $0xb8] sm:$0xff] %v652_v42 }
 0x17d   :  { %v555_v51 = vpop.f32.mrf.mxu3  ;;  %v1547_v57 = vpop.f32.mrf.mxu0 }
 0x17e   :  { %v556_v61 = vadd.f32 %v555_v51, %v4297_v37  ;;  %v1548_v62 = vadd.f32 %v1547_v57, %v4391_v45  ;;  %v1596_v0 = vpop.f32.mrf.mxu1  ;;  %v3797_v51 = vld [vmem:[#allocation10 + $0x244] sm:$0xf]  ;;  %v3369_v57 = vld [vmem:[#allocation10 + $0x24c] sm:$0xf0] }
 0x17f   :  { %v3372_v59 = vor.u32 %v3797_v51, %v3369_v57 }
 0x180   :  { %v616_v3 = vmax.f32 %v556_v61, 0.0  ;;  %v4413_v4 = vadd.f32 %v1596_v0, %v1548_v62  ;;  %1742 = vmatmul.bf16.gmra.mxu0 %v4273_v56  ;;  %1791 = vmatmul.bf16.gmra.mxu1 %v4275_v23  ;;  %v623_v62 = vmax.f32 %v512_v58, 0.0  ;;  %v3796_v58 = vld [vmem:[#allocation10 + $0x238] sm:$0xf0] }
 0x181   :  { %1883 = vmatpush.bf16.msrb.mxu3 %v3372_v59  ;;  %v3171_v59 = vld [vmem:[#allocation10 + $0xb0] sm:$0xf] }
 0x182   :  { %v654_v5 = vpack.c.bf16 %v616_v3, %v615_v18 }
 0x183   :  { %v3716_v11 = vld [vmem:[#allocation2 + $0xb4] sm:$0xf0]  ;;  %v3041_v15 = vld [vmem:[#allocation2 + $0xb8] sm:$0xf0] }
 0x184   :  { %686 = vst [vmem:[#allocation2 + $0xc8] sm:$0xff] %v654_v5  ;;  %v4418_v2 = vor.u32 %v3716_v11, %v3039_v49  ;;  %v4420_v10 = vor.u32 %v3714_v63, %v3041_v15  ;;  %v513_v11 = vpop.f32.mrf.mxu2 }
 0x185   :  { %v557_v24 = vpop.f32.mrf.mxu3  ;;  %v1549_v39 = vpop.f32.mrf.mxu0 }
 0x186   :  { %v558_v27 = vadd.f32 %v557_v24, %v4297_v37  ;;  %v1550_v48 = vadd.f32 %v1549_v39, %v4391_v45  ;;  %v1598_v14 = vpop.f32.mrf.mxu1  ;;  %1664 = vmatmul.bf16.gmra.mxu2 %v4418_v2  ;;  %1713 = vmatmul.bf16.gmra.mxu3 %v4420_v10 }
 0x188   :  { %v620_v41 = vmax.f32 %v558_v27, 0.0  ;;  %v4426_v42 = vadd.f32 %v1598_v14, %v1550_v48  ;;  %v514_v27 = vadd.f32 %v513_v11, %v4292_v31  ;;  %v3363_v31 = vld [vmem:[#allocation10 + $0x230] sm:$0xf] }
 0x18a   :  { %v656_v38 = vpack.c.bf16 %v620_v41, %v619_v35  ;;  %v627_v44 = vmax.f32 %v514_v27, 0.0 }
 0x18b   :  { %v3055_v15 = vld [vmem:[#allocation2 + $0xc8] sm:$0xf]  ;;  %v3718_v24 = vld [vmem:[#allocation2 + $0xcc] sm:$0xf] }
 0x18c   :  { %688 = vst [vmem:[#allocation2 + $0xd8] sm:$0xff] %v656_v38  ;;  %v3364_v38 = vor.u32 %v3796_v58, %v3363_v31  ;;  %v3351_v58 = vld [vmem:[#allocation10 + $0x218] sm:$0xf] }
 0x18d   :  { %v560_v18 = vpop.f32.mrf.mxu3  ;;  %v1552_v61 = vpop.f32.mrf.mxu0 }
 0x18e   :  { %v561_v0 = vadd.f32 %v560_v18, %v4297_v37  ;;  %v1553_v33 = vadd.f32 %v1552_v61, %v4391_v45  ;;  %v1601_v3 = vpop.f32.mrf.mxu1  ;;  %v3748_v18 = vld [vmem:[#allocation10 + $0xb8] sm:$0xf0]  ;;  %v3459_v61 = vld [vmem:[#allocation10 + $0x2f0] sm:$0xf]  ;;  %2023 = vmatpush.bf16.msrb.mxu2 %v3364_v38  ;;  %v3793_v38 = vld [vmem:[#allocation10 + $0x220] sm:$0xf0] }
 0x190   :  { %v624_v5 = vmax.f32 %v561_v0, 0.0  ;;  %v4431_v49 = vadd.f32 %v1601_v3, %v1553_v33  ;;  %1747 = vmatmul.bf16.gmra.mxu0 %v4283_v17  ;;  %1796 = vmatmul.bf16.gmra.mxu1 %v4286_v26  ;;  %v3172_v0 = vor.u32 %v3748_v18, %v3171_v59  ;;  %v3159_v59 = vld [vmem:[#allocation10 + $0x98] sm:$0xf]  ;;  %v3352_v18 = vor.u32 %v3793_v38, %v3351_v58  ;;  %v3339_v38 = vld [vmem:[#allocation10 + $0x200] sm:$0xf] }
 0x192   :  { %v658_v63 = vpack.c.bf16 %v624_v5, %v623_v62  ;;  %1925 = vmatpush.bf16.msrb.mxu0 %v3172_v0  ;;  %v3817_v0 = vld [vmem:[#allocation10 + $0x2e0] sm:$0xf0]  ;;  %2024 = vmatpush.bf16.msrb.mxu2 %v3352_v18 }
 0x193   :  { %v3720_v16 = vld [vmem:[#allocation2 + $0xd4] sm:$0xf0]  ;;  %v3057_v39 = vld [vmem:[#allocation2 + $0xd8] sm:$0xf0] }
 0x194   :  { %690 = vst [vmem:[#allocation2 + $0xe8] sm:$0xff] %v658_v63  ;;  %v4436_v48 = vor.u32 %v3720_v16, %v3055_v15  ;;  %v4438_v14 = vor.u32 %v3718_v24, %v3057_v39  ;;  %v3267_v63 = vld [vmem:[#allocation10 + $0x170] sm:$0xf]  ;;  %v3772_v15 = vld [vmem:[#allocation10 + $0x178] sm:$0xf0] }
 0x195   :  { %v562_v32 = vpop.f32.mrf.mxu3  ;;  %v1554_v35 = vpop.f32.mrf.mxu0  ;;  %v3268_v16 = vor.u32 %v3772_v15, %v3267_v63  ;;  %v3255_v63 = vld [vmem:[#allocation10 + $0x158] sm:$0xf]  ;;  %v3769_v15 = vld [vmem:[#allocation10 + $0x160] sm:$0xf0] }
 0x196   :  { %v563_v41 = vadd.f32 %v562_v32, %v4297_v37  ;;  %v1555_v60 = vadd.f32 %v1554_v35, %v4391_v45  ;;  %v1603_v43 = vpop.f32.mrf.mxu1  ;;  %1669 = vmatmul.bf16.gmra.mxu2 %v4436_v48  ;;  %1718 = vmatmul.bf16.gmra.mxu3 %v4438_v14  ;;  %v3820_v37 = vld [vmem:[#allocation10 + $0x2f8] sm:$0xf0] }
 0x197   :  { %v3460_v33 = vor.u32 %v3820_v37, %v3459_v61  ;;  %1974 = vmatpush.bf16.msrb.mxu1 %v3268_v16  ;;  %v3745_v61 = vld [vmem:[#allocation10 + $0xa0] sm:$0xf0]  ;;  %v3256_v16 = vor.u32 %v3769_v15, %v3255_v63  ;;  %v3135_v15 = vld [vmem:[#allocation10 + $0x68] sm:$0xf] }
 0x198   :  { %v628_v51 = vmax.f32 %v563_v41, 0.0  ;;  %v4444_v57 = vadd.f32 %v1603_v43, %v1555_v60  ;;  %v3160_v37 = vor.u32 %v3745_v61, %v3159_v59  ;;  %v3790_v59 = vld [vmem:[#allocation10 + $0x208] sm:$0xf0]  ;;  %v3435_v61 = vld [vmem:[#allocation10 + $0x2c0] sm:$0xf] }
 0x199   :  { %2072 = vmatpush.bf16.msra.mxu3 %v3460_v33 }
 0x19a   :  { %v660_v62 = vpack.c.bf16 %v628_v51, %v627_v44  ;;  %1926 = vmatpush.bf16.msrb.mxu0 %v3160_v37  ;;  %v3340_v37 = vor.u32 %v3790_v59, %v3339_v38 }
 0x19b   :  { %v3071_v39 = vld [vmem:[#allocation2 + $0xe8] sm:$0xf]  ;;  %v3722_v32 = vld [vmem:[#allocation2 + $0xec] sm:$0xf]  ;;  %1975 = vmatpush.bf16.msrb.mxu1 %v3256_v16  ;;  %v3739_v16 = vld [vmem:[#allocation10 + $0x70] sm:$0xf0] }
 0x19c   :  { %692 = vst [vmem:[#allocation2 + $0xf8] sm:$0xff] %v660_v62  ;;  %v3447_v62 = vld [vmem:[#allocation10 + $0x2d8] sm:$0xf]  ;;  %2025 = vmatpush.bf16.msrb.mxu2 %v3340_v37 }
 0x19d   :  { %v1557_v3 = vpop.f32.mrf.mxu0  ;;  %v3448_v33 = vor.u32 %v3817_v0, %v3447_v62 }
 0x19e   :  { %v1558_v5 = vadd.f32 %v1557_v3, %v4391_v45  ;;  %v1606_v11 = vpop.f32.mrf.mxu1 }
 0x19f   :  { %2073 = vmatpush.bf16.msra.mxu3 %v3448_v33  ;;  %v3814_v33 = vld [vmem:[#allocation10 + $0x2c8] sm:$0xf0] }
 0x1a0   :  { %v4447_v24 = vadd.f32 %v1606_v11, %v1558_v5  ;;  %1752 = vmatmul.bf16.gmra.mxu0 %v4300_v50  ;;  %1801 = vmatmul.bf16.gmra.mxu1 %v4302_v54 }
 0x1a3   :  { %v3724_v27 = vld [vmem:[#allocation2 + $0xf4] sm:$0xf0]  ;;  %v3073_v35 = vld [vmem:[#allocation2 + $0xf8] sm:$0xf0] }
 0x1a4   :  { %v4451_v41 = vor.u32 %v3724_v27, %v3071_v39  ;;  %v4453_v60 = vor.u32 %v3722_v32, %v3073_v35 }
 0x1a5   :  { %v1559_v43 = vpop.f32.mrf.mxu0 }
 0x1a6   :  { %v1560_v44 = vadd.f32 %v1559_v43, %v4391_v45  ;;  %v1608_v51 = vpop.f32.mrf.mxu1  ;;  %1674 = vmatmul.bf16.gmra.mxu2 %v4451_v41  ;;  %1723 = vmatmul.bf16.gmra.mxu3 %v4453_v60  ;;  %v3147_v43 = vld [vmem:[#allocation10 + $0x80] sm:$0xf] }
 0x1a8   :  { %v4458_v31 = vadd.f32 %v1608_v51, %v1560_v44  ;;  %v3742_v44 = vld [vmem:[#allocation10 + $0x88] sm:$0xf0]  ;;  %v3243_v51 = vld [vmem:[#allocation10 + $0x140] sm:$0xf] }
 0x1a9   :  { %v3148_v18 = vor.u32 %v3742_v44, %v3147_v43  ;;  %v3763_v43 = vld [vmem:[#allocation10 + $0x130] sm:$0xf0] }
 0x1ab   :  { %1927 = vmatpush.bf16.msrb.mxu0 %v3148_v18  ;;  %v3736_v18 = vld [vmem:[#allocation10 + $0x58] sm:$0xf0] }
 0x1ad   :  { %v1562_v3 = vpop.f32.mrf.mxu0 }
 0x1ae   :  { %v1563_v5 = vadd.f32 %v1562_v3, %v4391_v45  ;;  %v1611_v11 = vpop.f32.mrf.mxu1  ;;  %v3766_v3 = vld [vmem:[#allocation10 + $0x148] sm:$0xf0] }
 0x1af   :  { %v3244_v63 = vor.u32 %v3766_v3, %v3243_v51 }
 0x1b0   :  { %v4461_v39 = vadd.f32 %v1611_v11, %v1563_v5  ;;  %1757 = vmatmul.bf16.gmra.mxu0 %v4314_v28  ;;  %1806 = vmatmul.bf16.gmra.mxu1 %v4316_v29  ;;  %v3436_v11 = vor.u32 %v3814_v33, %v3435_v61  ;;  %v3219_v61 = vld [vmem:[#allocation10 + $0x110] sm:$0xf] }
 0x1b1   :  { %1976 = vmatpush.bf16.msrb.mxu1 %v3244_v63  ;;  %v3733_v63 = vld [vmem:[#allocation10 + $0x40] sm:$0xf0] }
 0x1b2   :  { %2074 = vmatpush.bf16.msra.mxu3 %v3436_v11  ;;  %v3111_v11 = vld [vmem:[#allocation10 + $0x38] sm:$0xf] }
 0x1b5   :  { %v1564_v27 = vpop.f32.mrf.mxu0 }
 0x1b6   :  { %v1565_v32 = vadd.f32 %v1564_v27, %v4391_v45  ;;  %v1613_v35 = vpop.f32.mrf.mxu1  ;;  %1835 = vmatmul.bf16.vlgmr.msra.gmra.mxu2 %v4321_v46  ;;  %1884 = vmatmul.bf16.vlgmr.msrb.gmra.mxu3 %v4323_v47  ;;  %v3231_v27 = vld [vmem:[#allocation10 + $0x128] sm:$0xf] }
 0x1b7   :  { %v3232_v47 = vor.u32 %v3763_v43, %v3231_v27  ;;  %v3112_v27 = vor.u32 %v3733_v63, %v3111_v11  ;;  %v3811_v11 = vld [vmem:[#allocation10 + $0x2b0] sm:$0xf0]  ;;  %v3754_v63 = vld [vmem:[#allocation10 + $0xe8] sm:$0xf0] }
 0x1b8   :  { %v4468_v58 = vadd.f32 %v1613_v35, %v1565_v32  ;;  %v3136_v35 = vor.u32 %v3739_v16, %v3135_v15  ;;  %v3207_v15 = vld [vmem:[#allocation10 + $0xf8] sm:$0xf] }
 0x1b9   :  { %v1640_v62 = vpop.f32.mrf.mxu2  ;;  %v1689_v0 = vpop.f32.mrf.mxu3  ;;  %1977 = vmatpush.bf16.msrb.mxu1 %v3232_v47  ;;  %v3099_v47 = vld [vmem:[#allocation10 + $0x20] sm:$0xf] }
 0x1ba   :  { %v1641_v5 = vadd.f32 %v1640_v62, %v4395_v7  ;;  %1928 = vmatpush.bf16.msrb.mxu0 %v3136_v35  ;;  %v3123_v7 = vld [vmem:[#allocation10 + $0x50] sm:$0xf]  ;;  %v3757_v35 = vld [vmem:[#allocation10 + $0x100] sm:$0xf0] }
 0x1bb   :  { %v3124_v62 = vor.u32 %v3736_v18, %v3123_v7  ;;  %v3195_v7 = vld [vmem:[#allocation10 + $0xe0] sm:$0xf] }
 0x1bc   :  { %v4471_v32 = vadd.f32 %v1689_v0, %v1641_v5  ;;  %v3760_v0 = vld [vmem:[#allocation10 + $0x118] sm:$0xf0] }
 0x1bd   :  { %v1567_v44 = vpop.f32.mrf.mxu0  ;;  %v3220_v3 = vor.u32 %v3760_v0, %v3219_v61  ;;  %v3327_v61 = vld [vmem:[#allocation10 + $0x1e8] sm:$0xf] }
 0x1be   :  { %v1568_v38 = vadd.f32 %v1567_v44, %v4391_v45  ;;  %v1616_v59 = vpop.f32.mrf.mxu1  ;;  %1929 = vmatpush.bf16.msrb.mxu0 %v3124_v62  ;;  %v3208_v44 = vor.u32 %v3757_v35, %v3207_v15  ;;  %v3787_v62 = vld [vmem:[#allocation10 + $0x1f0] sm:$0xf0]  ;;  %v3423_v0 = vld [vmem:[#allocation10 + $0x2a8] sm:$0xf] }
 0x1bf   :  { %1978 = vmatpush.bf16.msrb.mxu1 %v3220_v3  ;;  %v3424_v35 = vor.u32 %v3811_v11, %v3423_v0  ;;  %v3315_v11 = vld [vmem:[#allocation10 + $0x1d0] sm:$0xf] }
 0x1c0   :  { %v4474_v51 = vadd.f32 %v1616_v59, %v1568_v38  ;;  %1762 = vmatmul.bf16.gmra.mxu0 %v4332_v12  ;;  %1811 = vmatmul.bf16.gmra.mxu1 %v4334_v13 }
 0x1c1   :  { %v1642_v37 = vpop.f32.mrf.mxu2  ;;  %v1691_v33 = vpop.f32.mrf.mxu3  ;;  %2075 = vmatpush.bf16.msra.mxu3 %v3424_v35 }
 0x1c2   :  { %v1643_v5 = vadd.f32 %v1642_v37, %v4408_v36  ;;  %1930 = vmatpush.bf16.msrb.mxu0 %v3112_v27  ;;  %v3730_v36 = vld [vmem:[#allocation10 + $0x28] sm:$0xf0]  ;;  %v3087_v27 = vld [vmem:[#allocation10 + $0x8] sm:$0xf] }
 0x1c3   :  { %v3100_v37 = vor.u32 %v3730_v36, %v3099_v47  ;;  %1979 = vmatpush.bf16.msrb.mxu1 %v3208_v44  ;;  %v3751_v47 = vld [vmem:[#allocation10 + $0xd0] sm:$0xf0] }
 0x1c4   :  { %v4479_v16 = vadd.f32 %v1691_v33, %v1643_v5  ;;  %v3328_v5 = vor.u32 %v3787_v62, %v3327_v61 }
 0x1c5   :  { %v1569_v43 = vpop.f32.mrf.mxu0 }
 0x1c6   :  { %v1570_v38 = vadd.f32 %v1569_v43, %v4391_v45  ;;  %v1618_v59 = vpop.f32.mrf.mxu1  ;;  %1840 = vmatmul.bf16.gmra.mxu2 %v4343_v9  ;;  %1889 = vmatmul.bf16.gmra.mxu3 %v4345_v6  ;;  %v3196_v43 = vor.u32 %v3754_v63, %v3195_v7  ;;  %v3727_v6 = vld [vmem:[#allocation10 + $0x10] sm:$0xf0]  ;;  %v3784_v63 = vld [vmem:[#allocation10 + $0x1d8] sm:$0xf0] }
 0x1c7   :  { %2026 = vmatpush.bf16.msrb.mxu2 %v3328_v5  ;;  %1931 = vmatpush.bf16.msrb.mxu0 %v3100_v37  ;;  %v3088_v9 = vor.u32 %v3727_v6, %v3087_v27  ;;  %v3316_v27 = vor.u32 %v3784_v63, %v3315_v11 }
 0x1c8   :  { %v4484_v18 = vadd.f32 %v1618_v59, %v1570_v38  ;;  %v3183_v38 = vld [vmem:[#allocation10 + $0xc8] sm:$0xf]  ;;  %1980 = vmatpush.bf16.msrb.mxu1 %v3196_v43 }
 0x1c9   :  { %v1645_v33 = vpop.f32.mrf.mxu2  ;;  %v1694_v3 = vpop.f32.mrf.mxu3  ;;  %v3184_v44 = vor.u32 %v3751_v47, %v3183_v38  ;;  %v3808_v38 = vld [vmem:[#allocation10 + $0x298] sm:$0xf0] }
 0x1ca   :  { %v1646_v15 = vadd.f32 %v1645_v33, %v4413_v4 }
 0x1cb   :  { %1932 = vmatpush.bf16.msrb.mxu0 %v3088_v9  ;;  %2027 = vmatpush.bf16.msrb.mxu2 %v3316_v27 }
 0x1cc   :  { %v4487_v59 = vadd.f32 %v1694_v3, %v1646_v15  ;;  %1981 = vmatpush.bf16.msrb.mxu1 %v3184_v44  ;;  %v3411_v15 = vld [vmem:[#allocation10 + $0x290] sm:$0xf] }
 0x1cd   :  { %v1572_v36 = vpop.f32.mrf.mxu0  ;;  %v3412_v47 = vor.u32 %v3808_v38, %v3411_v15  ;;  %v3303_v15 = vld [vmem:[#allocation10 + $0x1b8] sm:$0xf] }
 0x1ce   :  { %v1573_v61 = vadd.f32 %v1572_v36, %v4391_v45  ;;  %v1621_v62 = vpop.f32.mrf.mxu1 }
 0x1cf   :  { %2076 = vmatpush.bf16.msra.mxu3 %v3412_v47  ;;  %v3805_v47 = vld [vmem:[#allocation10 + $0x280] sm:$0xf0] }
 0x1d0   :  { %v4490_v4 = vadd.f32 %v1621_v62, %v1573_v61  ;;  %1767 = vmatmul.bf16.gmra.mxu0 %v4352_v25  ;;  %1816 = vmatmul.bf16.gmra.mxu1 %v4355_v30 }
 0x1d1   :  { %v1647_v7 = vpop.f32.mrf.mxu2  ;;  %v1696_v0 = vpop.f32.mrf.mxu3 }
 0x1d2   :  { %v1648_v37 = vadd.f32 %v1647_v7, %v4426_v42 }
 0x1d4   :  { %v4495_v6 = vadd.f32 %v1696_v0, %v1648_v37 }
 0x1d5   :  { %v1574_v33 = vpop.f32.mrf.mxu0 }
 0x1d6   :  { %v1575_v3 = vadd.f32 %v1574_v33, %v4391_v45  ;;  %v1623_v5 = vpop.f32.mrf.mxu1  ;;  %1845 = vmatmul.bf16.gmra.mxu2 %v4361_v53  ;;  %1894 = vmatmul.bf16.gmra.mxu3 %v4363_v55 }
 0x1d8   :  { %v4500_v9 = vadd.f32 %v1623_v5, %v1575_v3 }
 0x1d9   :  { %v1650_v35 = vpop.f32.mrf.mxu2  ;;  %v1699_v43 = vpop.f32.mrf.mxu3 }
 0x1da   :  { %v1651_v42 = vadd.f32 %v1650_v35, %v4431_v49  ;;  %v3781_v35 = vld [vmem:[#allocation10 + $0x1c0] sm:$0xf0] }
 0x1dc   :  { %v4503_v36 = vadd.f32 %v1699_v43, %v1651_v42  ;;  %v3399_v43 = vld [vmem:[#allocation10 + $0x278] sm:$0xf]  ;;  %v3304_v42 = vor.u32 %v3781_v35, %v3303_v15 }
 0x1dd   :  { %v1577_v44 = vpop.f32.mrf.mxu0 }
 0x1de   :  { %v1578_v61 = vadd.f32 %v1577_v44, %v4391_v45  ;;  %v1626_v62 = vpop.f32.mrf.mxu1  ;;  %v3400_v44 = vor.u32 %v3805_v47, %v3399_v43  ;;  %2028 = vmatpush.bf16.msrb.mxu2 %v3304_v42  ;;  %v3802_v43 = vld [vmem:[#allocation10 + $0x268] sm:$0xf0] }
 0x1e0   :  { %v4506_v7 = vadd.f32 %v1626_v62, %v1578_v61  ;;  %1772 = vmatmul.bf16.gmra.mxu0 %v4369_v8  ;;  %1821 = vmatmul.bf16.gmra.mxu1 %v4372_v19 }
 0x1e1   :  { %v1652_v0 = vpop.f32.mrf.mxu2  ;;  %v1701_v37 = vpop.f32.mrf.mxu3  ;;  %2077 = vmatpush.bf16.msra.mxu3 %v3400_v44 }
 0x1e2   :  { %v1653_v33 = vadd.f32 %v1652_v0, %v4444_v57 }
 0x1e4   :  { %v4511_v49 = vadd.f32 %v1701_v37, %v1653_v33 }
 0x1e5   :  { %v1579_v3 = vpop.f32.mrf.mxu0 }
 0x1e6   :  { %v1580_v5 = vadd.f32 %v1579_v3, %v4391_v45  ;;  %1850 = vmatmul.bf16.gmra.mxu2 %v4377_v1  ;;  %1899 = vmatmul.bf16.gmra.mxu3 %v4379_v34  ;;  %v1628_v11 = vpop.f32.mrf.mxu1 }
 0x1e8   :  { %v4516_v63 = vadd.f32 %v1628_v11, %v1580_v5  ;;  %v3778_v5 = vld [vmem:[#allocation10 + $0x1a8] sm:$0xf0]  ;;  %v3387_v11 = vld [vmem:[#allocation10 + $0x260] sm:$0xf] }
 0x1e9   :  { %v1655_v27 = vpop.f32.mrf.mxu2  ;;  %v1704_v38 = vpop.f32.mrf.mxu3 }
 0x1ea   :  { %v1656_v57 = vadd.f32 %v1655_v27, %v4447_v24  ;;  %v3291_v24 = vld [vmem:[#allocation10 + $0x1a0] sm:$0xf] }
 0x1ec   :  { %v4519_v61 = vadd.f32 %v1704_v38, %v1656_v57 }
 0x1ed   :  { %v4521_v45 = vpop.f32.mrf.mxu0 }
 0x1ee   :  { %v4528_v3 = vpop.f32.mrf.mxu1 }
 0x1f0   :  { %1933 = vmatmul.bf16.vlgmr.msrb.gmra.mxu0 %v4261_v21  ;;  %1982 = vmatmul.bf16.vlgmr.msrb.gmra.mxu1 %v4263_v22  ;;  %v3292_v21 = vor.u32 %v3778_v5, %v3291_v24  ;;  %v3375_v24 = vld [vmem:[#allocation10 + $0x248] sm:$0xf] }
 0x1f1   :  { %v1657_v62 = vpop.f32.mrf.mxu2  ;;  %v1706_v0 = vpop.f32.mrf.mxu3 }
 0x1f2   :  { %v1658_v37 = vadd.f32 %v1657_v62, %v4458_v31  ;;  %v3388_v31 = vor.u32 %v3802_v43, %v3387_v11  ;;  %2029 = vmatpush.bf16.msrb.mxu2 %v3292_v21 }
 0x1f4   :  { %v4526_v33 = vadd.f32 %v1706_v0, %v1658_v37  ;;  %2078 = vmatpush.bf16.msra.mxu3 %v3388_v31  ;;  %v3775_v37 = vld [vmem:[#allocation10 + $0x190] sm:$0xf0] }
 0x1f5   :  { %v4532_v22 = vpop.f32.mrf.mxu0 }
 0x1f6   :  { %1855 = vmatmul.bf16.gmra.mxu2 %v4400_v20  ;;  %1904 = vmatmul.bf16.gmra.mxu3 %v4402_v52  ;;  %v4537_v42 = vpop.f32.mrf.mxu1 }
 0x1f9   :  { %v1660_v15 = vpop.f32.mrf.mxu2  ;;  %v1709_v35 = vpop.f32.mrf.mxu3 }
 0x1fa   :  { %v1661_v27 = vadd.f32 %v1660_v15, %v4461_v39  ;;  %v3279_v39 = vld [vmem:[#allocation10 + $0x188] sm:$0xf]  ;;  %v3799_v15 = vld [vmem:[#allocation10 + $0x250] sm:$0xf0] }
 0x1fc   :  { %v4535_v38 = vadd.f32 %v1709_v35, %v1661_v27 }
 0x1fd   :  { %v4542_v62 = vpop.f32.mrf.mxu0 }
 0x200   :  { %1938 = vmatmul.bf16.gmra.mxu0 %v4273_v56  ;;  %1987 = vmatmul.bf16.gmra.mxu1 %v4275_v23  ;;  %v3280_v56 = vor.u32 %v3775_v37, %v3279_v39  ;;  %v4548_v23 = vpop.f32.mrf.mxu1 }
 0x201   :  { %v1662_v47 = vpop.f32.mrf.mxu2  ;;  %v1711_v57 = vpop.f32.mrf.mxu3 }
 0x202   :  { %v1663_v44 = vadd.f32 %v1662_v47, %v4468_v58  ;;  %v3376_v58 = vor.u32 %v3799_v15, %v3375_v24  ;;  %2030 = vmatpush.bf16.msrb.mxu2 %v3280_v56 }
 0x204   :  { %v4544_v0 = vadd.f32 %v1711_v57, %v1663_v44  ;;  %2079 = vmatpush.bf16.msra.mxu3 %v3376_v58 }
 0x205   :  { %v4553_v43 = vpop.f32.mrf.mxu0 }
 0x206   :  { %1860 = vmatmul.bf16.gmra.mxu2 %v4418_v2  ;;  %1909 = vmatmul.bf16.gmra.mxu3 %v4420_v10 }
 0x208   :  { %v4558_v57 = vpop.f32.mrf.mxu1 }
 0x209   :  { %v1665_v5 = vpop.f32.mrf.mxu2  ;;  %v1714_v11 = vpop.f32.mrf.mxu3 }
 0x20a   :  { %v1666_v35 = vadd.f32 %v1665_v5, %v4474_v51 }
 0x20c   :  { %v4551_v21 = vadd.f32 %v1714_v11, %v1666_v35 }
 0x20d   :  { %v4564_v51 = vpop.f32.mrf.mxu0 }
 0x210   :  { %1943 = vmatmul.bf16.gmra.mxu0 %v4283_v17  ;;  %1992 = vmatmul.bf16.gmra.mxu1 %v4286_v26  ;;  %v4569_v26 = vpop.f32.mrf.mxu1 }
 0x211   :  { %v1667_v27 = vpop.f32.mrf.mxu2  ;;  %v1716_v31 = vpop.f32.mrf.mxu3 }
 0x212   :  { %v1668_v47 = vadd.f32 %v1667_v27, %v4484_v18 }
 0x214   :  { %v4560_v44 = vadd.f32 %v1716_v31, %v1668_v47  ;;  %v4588_v31 = vperm.slane %v4387_v40, 1  ;;  %v3860_v47 = vld [vmem:[#allocation12 + $0x78] sm:$0xff]  ;;  %v3851_v40 = vld [vmem:[#allocation12 + $0x30] sm:$0xff] }
 0x215   :  { %v4573_v11 = vpop.f32.mrf.mxu0  ;;  %2638 = vmatpush.bf16.msra.mxu1 %v3860_v47 }
 0x216   :  { %1865 = vmatmul.bf16.gmra.mxu2 %v4436_v48  ;;  %1914 = vmatmul.bf16.gmra.mxu3 %v4438_v14 }
 0x219   :  { %v1670_v39 = vpop.f32.mrf.mxu2  ;;  %v1719_v37 = vpop.f32.mrf.mxu3 }
 0x21a   :  { %v1671_v17 = vadd.f32 %v1670_v39, %v4490_v4  ;;  %v4580_v4 = vpop.f32.mrf.mxu1 }
 0x21c   :  { %v4567_v24 = vadd.f32 %v1719_v37, %v1671_v17 }
 0x21d   :  { %v4583_v27 = vpop.f32.mrf.mxu0 }
 0x220   :  { %1948 = vmatmul.bf16.gmra.mxu0 %v4300_v50  ;;  %1997 = vmatmul.bf16.gmra.mxu1 %v4302_v54 }
 0x221   :  { %v1672_v18 = vpop.f32.mrf.mxu2  ;;  %v1721_v5 = vpop.f32.mrf.mxu3 }
 0x222   :  { %v1673_v56 = vadd.f32 %v1672_v18, %v4500_v9  ;;  %v3852_v9 = vld [vmem:[#allocation12 + $0x38] sm:$0xff]  ;;  %v4592_v17 = vpop.f32.mrf.mxu1 }
 0x223   :  { %2589 = vmatpush.bf16.msra.mxu0 %v3852_v9 }
 0x224   :  { %v4576_v15 = vadd.f32 %v1721_v5, %v1673_v56  ;;  %v3859_v56 = vld [vmem:[#allocation12 + $0x70] sm:$0xff] }
 0x225   :  { %2639 = vmatpush.bf16.msra.mxu1 %v3859_v56  ;;  %v2121_v56 = vmax.f32 %v4471_v32, 0.0  ;;  %v1744_v32 = vadd.f32 %v4542_v62, %v4588_v31 }
 0x226   :  { %1870 = vmatmul.bf16.gmra.mxu2 %v4451_v41  ;;  %1919 = vmatmul.bf16.gmra.mxu3 %v4453_v60 }
 0x227   :  { %2590 = vmatpush.bf16.msra.mxu0 %v3851_v40  ;;  %v3857_v40 = vld [vmem:[#allocation12 + $0x60] sm:$0xff] }
 0x229   :  { %v1675_v35 = vpop.f32.mrf.mxu2  ;;  %v1724_v58 = vpop.f32.mrf.mxu3 }
 0x22a   :  { %v1676_v50 = vadd.f32 %v1675_v35, %v4506_v7  ;;  %v1739_v7 = vadd.f32 %v4521_v45, %v4588_v31  ;;  %v3868_v45 = vld [vmem:[#allocation12 + $0xb8] sm:$0xff] }
 0x22b   :  { %2687 = vmatpush.bf16.msra.mxu2 %v3868_v45  ;;  %v3855_v45 = vld [vmem:[#allocation12 + $0x50] sm:$0xff] }
 0x22c   :  { %v4585_v54 = vadd.f32 %v1724_v58, %v1676_v50  ;;  %v1788_v35 = vadd.f32 %v4528_v3, %v1739_v7  ;;  %v3858_v58 = vld [vmem:[#allocation12 + $0x68] sm:$0xff] }
 0x22d   :  { %2640 = vmatpush.bf16.msra.mxu1 %v3858_v58 }
 0x230   :  { %1953 = vmatmul.bf16.gmra.mxu0 %v4314_v28  ;;  %2002 = vmatmul.bf16.gmra.mxu1 %v4316_v29  ;;  %v4599_v28 = vpop.f32.mrf.mxu0  ;;  %v4793_v29 = vld [vmem:[#allocation18_spill] sm:$0xff] }
 0x231   :  { %v1677_v39 = vpop.f32.mrf.mxu2  ;;  %v1726_v37 = vpop.f32.mrf.mxu3  ;;  %2641 = vmatpush.bf16.msra.mxu1 %v3857_v40  ;;  %v1793_v40 = vadd.f32 %v4548_v23, %v1744_v32  ;;  %v2127_v23 = vmax.f32 %v4487_v59, 0.0 }
 0x232   :  { %v1678_v18 = vadd.f32 %v1677_v39, %v4516_v63  ;;  %v3850_v63 = vld [vmem:[#allocation12 + $0x28] sm:$0xff]  ;;  %v1741_v39 = vadd.f32 %v4532_v22, %v4588_v31  ;;  %v3848_v22 = vld [vmem:[#allocation12 + $0x18] sm:$0xff] }
 0x233   :  { %2591 = vmatpush.bf16.msra.mxu0 %v3850_v63  ;;  %v3856_v63 = vld [vmem:[#allocation12 + $0x58] sm:$0xff] }
 0x234   :  { %v4597_v5 = vadd.f32 %v1726_v37, %v1678_v18  ;;  %v4606_v37 = vpop.f32.mrf.mxu1  ;;  %v3849_v18 = vld [vmem:[#allocation12 + $0x20] sm:$0xff]  ;;  %v1790_v7 = vadd.f32 %v4537_v42, %v1741_v39  ;;  %v3847_v42 = vld [vmem:[#allocation12 + $0x10] sm:$0xff]  ;;  %v2124_v39 = vmax.f32 %v4479_v16, 0.0 }
 0x235   :  { %2642 = vmatpush.bf16.msra.mxu1 %v3856_v63  ;;  %v3867_v63 = vld [vmem:[#allocation12 + $0xb0] sm:$0xff] }
 0x236   :  { %2031 = vmatmul.bf16.vlgmr.msrb.gmra.mxu2 %v4321_v46  ;;  %2080 = vmatmul.bf16.vlgmr.msra.gmra.mxu3 %v4793_v29 }
 0x237   :  { %2592 = vmatpush.bf16.msra.mxu0 %v3849_v18  ;;  %v4795_v18 = vld [vmem:[#allocation20_spill] sm:$0xff]  ;;  %2688 = vmatpush.bf16.msra.mxu2 %v3867_v63 }
 0x238   :  { %v4610_v29 = vpop.f32.mrf.mxu0 }
 0x239   :  { %v1836_v50 = vpop.f32.mrf.mxu2  ;;  %v1885_v9 = vpop.f32.mrf.mxu3  ;;  %2643 = vmatpush.bf16.msra.mxu1 %v3855_v45 }
 0x23a   :  { %v1837_v47 = vadd.f32 %v1836_v50, %v1788_v35 }
 0x23b   :  { %2593 = vmatpush.bf16.msra.mxu0 %v3848_v22 }
 0x23c   :  { %v1886_v46 = vadd.f32 %v1885_v9, %v1837_v47 }
 0x23e   :  { %v2122_v3 = vmax.f32 %v1886_v46, 0.0  ;;  %v4617_v46 = vpop.f32.mrf.mxu1 }
 0x23f   :  { %2594 = vmatpush.bf16.msra.mxu0 %v3847_v42 }
 0x240   :  { %v2169_v35 = vpack.c.bf16 %v2122_v3, %v2121_v56  ;;  %1958 = vmatmul.bf16.gmra.mxu0 %v4332_v12  ;;  %2007 = vmatmul.bf16.gmra.mxu1 %v4334_v13  ;;  %v4794_v13 = vld [vmem:[#allocation19_spill] sm:$0xff]  ;;  %v4622_v22 = vpop.f32.mrf.mxu0 }
 0x241   :  { %v1838_v58 = vpop.f32.mrf.mxu2  ;;  %v1887_v50 = vpop.f32.mrf.mxu3  ;;  %v3846_v3 = vld [vmem:[#allocation12 + $0x8] sm:$0xff] }
 0x242   :  { %2201 = vst [vmem:[#allocation3] sm:$0xff] %v2169_v35  ;;  %v1839_v9 = vadd.f32 %v1838_v58, %v1790_v7  ;;  %v3854_v7 = vld [vmem:[#allocation12 + $0x48] sm:$0xff]  ;;  %v1746_v58 = vadd.f32 %v4553_v43, %v4588_v31 }
 0x243   :  { %2595 = vmatpush.bf16.msra.mxu0 %v3846_v3  ;;  %2644 = vmatpush.bf16.msra.mxu1 %v3854_v7 }
 0x244   :  { %v1888_v47 = vadd.f32 %v1887_v50, %v1839_v9  ;;  %v3845_v9 = vld [vmem:[#allocation12] sm:$0xff]  ;;  %v1795_v42 = vadd.f32 %v4558_v57, %v1746_v58 }
 0x246   :  { %v2125_v12 = vmax.f32 %v1888_v47, 0.0  ;;  %2036 = vmatmul.bf16.gmra.mxu2 %v4794_v13  ;;  %2085 = vmatmul.bf16.gmra.mxu3 %v4795_v18  ;;  %v3853_v47 = vld [vmem:[#allocation12 + $0x40] sm:$0xff]  ;;  %v4628_v45 = vpop.f32.mrf.mxu1  ;;  %v1749_v18 = vadd.f32 %v4564_v51, %v4588_v31  ;;  %v3866_v51 = vld [vmem:[#allocation12 + $0xa8] sm:$0xff] }
 0x247   :  { %2596 = vmatpush.bf16.msra.mxu0 %v3845_v9  ;;  %2645 = vmatpush.bf16.msra.mxu1 %v3853_v47 }
 0x248   :  { %v2171_v56 = vpack.c.bf16 %v2125_v12, %v2124_v39  ;;  %v4634_v59 = vpop.f32.mrf.mxu0  ;;  %2689 = vmatpush.bf16.msra.mxu2 %v3866_v51 }
 0x249   :  { %v1841_v62 = vpop.f32.mrf.mxu2  ;;  %v1890_v35 = vpop.f32.mrf.mxu3 }
 0x24a   :  { %2203 = vst [vmem:[#allocation3 + $0xc] sm:$0xff] %v2171_v56  ;;  %v1842_v16 = vadd.f32 %v1841_v62, %v1793_v40  ;;  %v2130_v56 = vmax.f32 %v4495_v6, 0.0  ;;  %v2133_v6 = vmax.f32 %v4503_v36, 0.0 }
 0x24c   :  { %v1891_v50 = vadd.f32 %v1890_v35, %v1842_v16  ;;  %v1751_v16 = vadd.f32 %v4573_v11, %v4588_v31  ;;  %v1754_v11 = vadd.f32 %v4583_v27, %v4588_v31  ;;  %v3865_v27 = vld [vmem:[#allocation12 + $0xa0] sm:$0xff] }
 0x24d   :  { %2690 = vmatpush.bf16.msra.mxu2 %v3865_v27 }
 0x24e   :  { %v2128_v32 = vmax.f32 %v1891_v50, 0.0  ;;  %v4640_v62 = vpop.f32.mrf.mxu1 }
 0x250   :  { %v2173_v39 = vpack.c.bf16 %v2128_v32, %v2127_v23  ;;  %1963 = vmatmul.bf16.gmra.mxu0 %v4352_v25  ;;  %2012 = vmatmul.bf16.gmra.mxu1 %v4355_v30  ;;  %v1798_v25 = vadd.f32 %v4569_v26, %v1749_v18  ;;  %v1800_v26 = vadd.f32 %v4580_v4, %v1751_v16  ;;  %v2136_v32 = vmax.f32 %v4511_v49, 0.0 }
 0x251   :  { %v1843_v12 = vpop.f32.mrf.mxu2  ;;  %v1892_v43 = vpop.f32.mrf.mxu3  ;;  %v3465_v18 = vld [vmem:[#allocation3 + $0xc] sm:$0xf0]  ;;  %v1756_v49 = vadd.f32 %v4599_v28, %v4588_v31 }
 0x252   :  { %2205 = vst [vmem:[#allocation3 + $0x18] sm:$0xff] %v2173_v39  ;;  %v1844_v13 = vadd.f32 %v1843_v12, %v1795_v42 }
 0x254   :  { %v1893_v40 = vadd.f32 %v1892_v43, %v1844_v13  ;;  %v3822_v13 = vld [vmem:[#allocation3 + $0x8] sm:$0xf0] }
 0x256   :  { %v2131_v57 = vmax.f32 %v1893_v40, 0.0  ;;  %2041 = vmatmul.bf16.gmra.mxu2 %v4361_v53  ;;  %2090 = vmatmul.bf16.gmra.mxu3 %v4363_v55  ;;  %v4645_v53 = vpop.f32.mrf.mxu0  ;;  %v4652_v23 = vpop.f32.mrf.mxu1 }
 0x258   :  { %v2175_v30 = vpack.c.bf16 %v2131_v57, %v2130_v56  ;;  %v3821_v56 = vld [vmem:[#allocation3 + $0x4] sm:$0xf] }
 0x259   :  { %v1846_v3 = vpop.f32.mrf.mxu2  ;;  %v1895_v7 = vpop.f32.mrf.mxu3 }
 0x25a   :  { %2207 = vst [vmem:[#allocation3 + $0x24] sm:$0xff] %v2175_v30  ;;  %v1847_v35 = vadd.f32 %v1846_v3, %v1798_v25  ;;  %v3468_v30 = vor.u32 %v3821_v56, %v3465_v18  ;;  %v1805_v3 = vadd.f32 %v4606_v37, %v1756_v49  ;;  %v1764_v49 = vadd.f32 %v4634_v59, %v4588_v31 }
 0x25c   :  { %v1896_v63 = vadd.f32 %v1895_v7, %v1847_v35 }
 0x25e   :  { %v2134_v55 = vmax.f32 %v1896_v63, 0.0  ;;  %v1759_v63 = vadd.f32 %v4610_v29, %v4588_v31 }
 0x260   :  { %v2177_v58 = vpack.c.bf16 %v2134_v55, %v2133_v6  ;;  %1968 = vmatmul.bf16.gmra.mxu0 %v4369_v8  ;;  %2017 = vmatmul.bf16.gmra.mxu1 %v4372_v19  ;;  %v1803_v8 = vadd.f32 %v4592_v17, %v1754_v11  ;;  %v4658_v19 = vpop.f32.mrf.mxu0  ;;  %v4663_v17 = vpop.f32.mrf.mxu1  ;;  %v2142_v6 = vmax.f32 %v4526_v33, 0.0  ;;  %v1808_v37 = vadd.f32 %v4617_v46, %v1759_v63  ;;  %v3864_v11 = vld [vmem:[#allocation12 + $0x98] sm:$0xff] }
 0x261   :  { %v1848_v50 = vpop.f32.mrf.mxu2  ;;  %v1897_v9 = vpop.f32.mrf.mxu3  ;;  %v3477_v29 = vld [vmem:[#allocation3 + $0x24] sm:$0xf0]  ;;  %v1761_v33 = vadd.f32 %v4622_v22, %v4588_v31  ;;  %2691 = vmatpush.bf16.msra.mxu2 %v3864_v11  ;;  %v2145_v46 = vmax.f32 %v4535_v38, 0.0  ;;  %v2148_v38 = vmax.f32 %v4544_v0, 0.0  ;;  %v1766_v0 = vadd.f32 %v4645_v53, %v4588_v31 }
 0x262   :  { %2209 = vst [vmem:[#allocation3 + $0x30] sm:$0xff] %v2177_v58  ;;  %v1849_v47 = vadd.f32 %v1848_v50, %v1800_v26 }
 0x264   :  { %v1898_v36 = vadd.f32 %v1897_v9, %v1849_v47 }
 0x266   :  { %v2137_v42 = vmax.f32 %v1898_v36, 0.0  ;;  %2046 = vmatmul.bf16.gmra.mxu2 %v4377_v1  ;;  %2095 = vmatmul.bf16.gmra.mxu3 %v4379_v34  ;;  %v3463_v1 = vld [vmem:[#allocation3] sm:$0xf]  ;;  %v2139_v34 = vmax.f32 %v4519_v61, 0.0  ;;  %v3825_v36 = vld [vmem:[#allocation3 + $0x20] sm:$0xf0] }
 0x267   :  { %v3464_v25 = vor.u32 %v3822_v13, %v3463_v1 }
 0x268   :  { %v2179_v4 = vpack.c.bf16 %v2137_v42, %v2136_v32  ;;  %v4666_v16 = vpop.f32.mrf.mxu0  ;;  %v4674_v26 = vpop.f32.mrf.mxu1  ;;  %v3824_v42 = vld [vmem:[#allocation3 + $0x1c] sm:$0xf] }
 0x269   :  { %v1851_v39 = vpop.f32.mrf.mxu2  ;;  %v1900_v12 = vpop.f32.mrf.mxu3 }
 0x26a   :  { %2211 = vst [vmem:[#allocation3 + $0x3c] sm:$0xff] %v2179_v4  ;;  %v1852_v43 = vadd.f32 %v1851_v39, %v1803_v8  ;;  %v3480_v39 = vor.u32 %v3824_v42, %v3477_v29 }
 0x26c   :  { %v1901_v40 = vadd.f32 %v1900_v12, %v1852_v43  ;;  %v1810_v12 = vadd.f32 %v4628_v45, %v1761_v33  ;;  %v1813_v45 = vadd.f32 %v4640_v62, %v1764_v49 }
 0x26e   :  { %v2140_v57 = vmax.f32 %v1901_v40, 0.0 }
 0x270   :  { %v2181_v7 = vpack.c.bf16 %v2140_v57, %v2139_v34  ;;  %2597 = vmatmul.bf16.vlgmr.msra.gmra.mxu0 %v3464_v25  ;;  %2646 = vmatmul.bf16.vlgmr.msra.gmra.mxu1 %v3468_v30  ;;  %v4678_v32 = vpop.f32.mrf.mxu0  ;;  %v4682_v18 = vpop.f32.mrf.mxu1 }
 0x271   :  { %v1853_v35 = vpop.f32.mrf.mxu2  ;;  %v1902_v51 = vpop.f32.mrf.mxu3  ;;  %v3489_v59 = vld [vmem:[#allocation3 + $0x3c] sm:$0xf0] }
 0x272   :  { %2213 = vst [vmem:[#allocation3 + $0x48] sm:$0xff] %v2181_v7  ;;  %v1854_v28 = vadd.f32 %v1853_v35, %v1805_v3  ;;  %v3863_v3 = vld [vmem:[#allocation12 + $0x90] sm:$0xff]  ;;  %v3828_v7 = vld [vmem:[#allocation3 + $0x38] sm:$0xf0] }
 0x273   :  { %2692 = vmatpush.bf16.msra.mxu2 %v3863_v3 }
 0x274   :  { %v1903_v61 = vadd.f32 %v1902_v51, %v1854_v28  ;;  %v3827_v28 = vld [vmem:[#allocation3 + $0x34] sm:$0xf] }
 0x276   :  { %v2143_v55 = vmax.f32 %v1903_v61, 0.0  ;;  %2051 = vmatmul.bf16.gmra.mxu2 %v4400_v20  ;;  %2100 = vmatmul.bf16.gmra.mxu3 %v4402_v52  ;;  %v3475_v52 = vld [vmem:[#allocation3 + $0x18] sm:$0xf]  ;;  %v3492_v61 = vor.u32 %v3827_v28, %v3489_v59  ;;  %v3861_v59 = vld [vmem:[#allocation12 + $0x80] sm:$0xff] }
 0x277   :  { %v3476_v4 = vor.u32 %v3825_v36, %v3475_v52 }
 0x278   :  { %v2183_v58 = vpack.c.bf16 %v2143_v55, %v2142_v6  ;;  %v4687_v1 = vpop.f32.mrf.mxu0  ;;  %v4694_v35 = vpop.f32.mrf.mxu1  ;;  %v1815_v6 = vadd.f32 %v4652_v23, %v1766_v0 }
 0x279   :  { %v1856_v50 = vpop.f32.mrf.mxu2  ;;  %v1905_v9 = vpop.f32.mrf.mxu3 }
 0x27a   :  { %2215 = vst [vmem:[#allocation3 + $0x54] sm:$0xff] %v2183_v58  ;;  %v1857_v47 = vadd.f32 %v1856_v50, %v1808_v37 }
 0x27c   :  { %v1906_v20 = vadd.f32 %v1905_v9, %v1857_v47  ;;  %v1769_v9 = vadd.f32 %v4658_v19, %v4588_v31  ;;  %v3862_v19 = vld [vmem:[#allocation12 + $0x88] sm:$0xff] }
 0x27d   :  { %2693 = vmatpush.bf16.msra.mxu2 %v3862_v19 }
 0x27e   :  { %v2146_v8 = vmax.f32 %v1906_v20, 0.0  ;;  %v1818_v23 = vadd.f32 %v4663_v17, %v1769_v9 }
 0x280   :  { %v2185_v43 = vpack.c.bf16 %v2146_v8, %v2145_v46  ;;  %2602 = vmatmul.bf16.gmra.mxu0 %v3476_v4  ;;  %2651 = vmatmul.bf16.gmra.mxu1 %v3480_v39  ;;  %v4698_v55 = vpop.f32.mrf.mxu0  ;;  %v4703_v11 = vpop.f32.mrf.mxu1  ;;  %v3830_v39 = vld [vmem:[#allocation3 + $0x4c] sm:$0xf] }
 0x281   :  { %v1858_v27 = vpop.f32.mrf.mxu2  ;;  %v1907_v13 = vpop.f32.mrf.mxu3  ;;  %v3831_v46 = vld [vmem:[#allocation3 + $0x50] sm:$0xf0]  ;;  %v3501_v8 = vld [vmem:[#allocation3 + $0x54] sm:$0xf0]  ;;  %2694 = vmatpush.bf16.msra.mxu2 %v3861_v59 }
 0x282   :  { %2217 = vst [vmem:[#allocation3 + $0x60] sm:$0xff] %v2185_v43  ;;  %v1859_v22 = vadd.f32 %v1858_v27, %v1810_v12  ;;  %v3504_v43 = vor.u32 %v3830_v39, %v3501_v8 }
 0x284   :  { %v1908_v40 = vadd.f32 %v1907_v13, %v1859_v22 }
 0x286   :  { %v2149_v56 = vmax.f32 %v1908_v40, 0.0  ;;  %2056 = vmatmul.bf16.gmra.mxu2 %v4418_v2  ;;  %2105 = vmatmul.bf16.gmra.mxu3 %v4420_v10  ;;  %v3487_v2 = vld [vmem:[#allocation3 + $0x30] sm:$0xf]  ;;  %v2151_v10 = vmax.f32 %v4551_v21, 0.0  ;;  %v2154_v21 = vmax.f32 %v4560_v44, 0.0  ;;  %v1771_v44 = vadd.f32 %v4666_v16, %v4588_v31 }
 0x287   :  { %v3488_v63 = vor.u32 %v3828_v7, %v3487_v2 }
 0x288   :  { %v2187_v34 = vpack.c.bf16 %v2149_v56, %v2148_v38  ;;  %v4708_v52 = vpop.f32.mrf.mxu0  ;;  %v1820_v27 = vadd.f32 %v4674_v26, %v1771_v44  ;;  %v4714_v13 = vpop.f32.mrf.mxu1  ;;  %v1774_v38 = vadd.f32 %v4678_v32, %v4588_v31 }
 0x289   :  { %v1861_v57 = vpop.f32.mrf.mxu2  ;;  %v1910_v25 = vpop.f32.mrf.mxu3  ;;  %v3511_v2 = vld [vmem:[#allocation3 + $0x60] sm:$0xf] }
 0x28a   :  { %2219 = vst [vmem:[#allocation3 + $0x6c] sm:$0xff] %v2187_v34  ;;  %v1862_v30 = vadd.f32 %v1861_v57, %v1813_v45  ;;  %v2160_v45 = vmax.f32 %v4576_v15, 0.0  ;;  %v1823_v26 = vadd.f32 %v4682_v18, %v1774_v38 }
 0x28c   :  { %v1911_v51 = vadd.f32 %v1910_v25, %v1862_v30 }
 0x28e   :  { %v2152_v62 = vmax.f32 %v1911_v51, 0.0  ;;  %v1776_v51 = vadd.f32 %v4687_v1, %v4588_v31 }
 0x290   :  { %v2189_v37 = vpack.c.bf16 %v2152_v62, %v2151_v10  ;;  %2607 = vmatmul.bf16.gmra.mxu0 %v3488_v63  ;;  %2656 = vmatmul.bf16.gmra.mxu1 %v3492_v61  ;;  %v4718_v56 = vpop.f32.mrf.mxu0  ;;  %v1988_v3 = vpop.f32.mrf.mxu1  ;;  %v1825_v63 = vadd.f32 %v4694_v35, %v1776_v51  ;;  %v3940_v61 = vld [vmem:[%s4783_s4] sm:$0x7]  ;;  %v2166_v35 = vmax.f32 %v4597_v5, 0.0 }
 0x291   :  { %v1863_v58 = vpop.f32.mrf.mxu2  ;;  %v1912_v53 = vpop.f32.mrf.mxu3  ;;  %v3834_v32 = vld [vmem:[#allocation3 + $0x68] sm:$0xf0]  ;;  %v3513_v0 = vld [vmem:[#allocation3 + $0x6c] sm:$0xf0] }
 0x292   :  { %2221 = vst [vmem:[#allocation3 + $0x78] sm:$0xff] %v2189_v37  ;;  %v1864_v50 = vadd.f32 %v1863_v58, %v1815_v6  ;;  %v3512_v10 = vor.u32 %v3834_v32, %v3511_v2  ;;  %v4731_v6 = vperm.slane %v3940_v61, 2 }
 0x294   :  { %v1913_v47 = vadd.f32 %v1912_v53, %v1864_v50  ;;  %v1937_v19 = vadd.f32 %v4708_v52, %v4731_v6  ;;  %v1940_v52 = vadd.f32 %v4718_v56, %v4731_v6 }
 0x296   :  { %v2155_v36 = vmax.f32 %v1913_v47, 0.0  ;;  %2061 = vmatmul.bf16.gmra.mxu2 %v4436_v48  ;;  %2110 = vmatmul.bf16.gmra.mxu3 %v4438_v14  ;;  %v3499_v48 = vld [vmem:[#allocation3 + $0x48] sm:$0xf]  ;;  %v2157_v14 = vmax.f32 %v4567_v24, 0.0 }
 0x297   :  { %v3500_v12 = vor.u32 %v3831_v46, %v3499_v48 }
 0x298   :  { %v2191_v29 = vpack.c.bf16 %v2155_v36, %v2154_v21  ;;  %v1941_v28 = vpop.f32.mrf.mxu0  ;;  %v1990_v53 = vpop.f32.mrf.mxu1 }
 0x299   :  { %v1866_v33 = vpop.f32.mrf.mxu2  ;;  %v1915_v20 = vpop.f32.mrf.mxu3  ;;  %v3836_v8 = vld [vmem:[#allocation3 + $0x7c] sm:$0xf] }
 0x29a   :  { %2223 = vst [vmem:[#allocation3 + $0x84] sm:$0xff] %v2191_v29  ;;  %v1867_v42 = vadd.f32 %v1866_v33, %v1818_v23 }
 0x29c   :  { %v1916_v4 = vadd.f32 %v1915_v20, %v1867_v42 }
 0x29e   :  { %v2158_v17 = vmax.f32 %v1916_v4, 0.0 }
 0x2a0   :  { %v2193_v22 = vpack.c.bf16 %v2158_v17, %v2157_v14  ;;  %2612 = vmatmul.bf16.gmra.mxu0 %v3500_v12  ;;  %2661 = vmatmul.bf16.gmra.mxu1 %v3504_v43  ;;  %v1944_v21 = vpop.f32.mrf.mxu0  ;;  %v1993_v44 = vpop.f32.mrf.mxu1 }
 0x2a1   :  { %v1868_v49 = vpop.f32.mrf.mxu2  ;;  %v1917_v40 = vpop.f32.mrf.mxu3  ;;  %v3837_v20 = vld [vmem:[#allocation3 + $0x80] sm:$0xf0]  ;;  %v3525_v42 = vld [vmem:[#allocation3 + $0x84] sm:$0xf0] }
 0x2a2   :  { %2225 = vst [vmem:[#allocation3 + $0x90] sm:$0xff] %v2193_v22  ;;  %v1869_v16 = vadd.f32 %v1868_v49, %v1820_v27  ;;  %v3528_v48 = vor.u32 %v3836_v8, %v3525_v42  ;;  %v1989_v49 = vadd.f32 %v1988_v3, %v1940_v52 }
 0x2a4   :  { %v1918_v24 = vadd.f32 %v1917_v40, %v1869_v16 }
 0x2a6   :  { %v2161_v34 = vmax.f32 %v1918_v24, 0.0  ;;  %2066 = vmatmul.bf16.gmra.mxu2 %v4451_v41  ;;  %2115 = vmatmul.bf16.gmra.mxu3 %v4453_v60  ;;  %v3833_v41 = vld [vmem:[#allocation3 + $0x64] sm:$0xf]  ;;  %v2163_v60 = vmax.f32 %v4585_v54, 0.0  ;;  %v1935_v54 = vadd.f32 %v4698_v55, %v4731_v6  ;;  %v3523_v55 = vld [vmem:[#allocation3 + $0x78] sm:$0xf] }
 0x2a7   :  { %v3516_v62 = vor.u32 %v3833_v41, %v3513_v0  ;;  %v3524_v5 = vor.u32 %v3837_v20, %v3523_v55 }
 0x2a8   :  { %v2195_v57 = vpack.c.bf16 %v2161_v34, %v2160_v45  ;;  %v1984_v47 = vadd.f32 %v4703_v11, %v1935_v54  ;;  %v1986_v11 = vadd.f32 %v4714_v13, %v1937_v19  ;;  %v1946_v12 = vpop.f32.mrf.mxu0  ;;  %v1995_v40 = vpop.f32.mrf.mxu1 }
 0x2a9   :  { %v1871_v25 = vpop.f32.mrf.mxu2  ;;  %v1920_v30 = vpop.f32.mrf.mxu3 }
 0x2aa   :  { %2227 = vst [vmem:[#allocation3 + $0x9c] sm:$0xff] %v2195_v57  ;;  %v1872_v7 = vadd.f32 %v1871_v25, %v1823_v26  ;;  %v1942_v26 = vadd.f32 %v1941_v28, %v4731_v6  ;;  %v1945_v28 = vadd.f32 %v1944_v21, %v4731_v6 }
 0x2ac   :  { %v1921_v15 = vadd.f32 %v1920_v30, %v1872_v7  ;;  %v3535_v30 = vld [vmem:[#allocation3 + $0x90] sm:$0xf]  ;;  %v3839_v7 = vld [vmem:[#allocation3 + $0x94] sm:$0xf]  ;;  %v1991_v0 = vadd.f32 %v1990_v53, %v1942_v26 }
 0x2ae   :  { %v2164_v18 = vmax.f32 %v1921_v15, 0.0 }
 0x2b0   :  { %v2197_v37 = vpack.c.bf16 %v2164_v18, %v2163_v60  ;;  %2617 = vmatmul.bf16.gmra.mxu0 %v3512_v10  ;;  %2666 = vmatmul.bf16.gmra.mxu1 %v3516_v62  ;;  %v1949_v57 = vpop.f32.mrf.mxu0  ;;  %v1998_v60 = vpop.f32.mrf.mxu1 }
 0x2b1   :  { %v1873_v31 = vpop.f32.mrf.mxu2  ;;  %v1922_v1 = vpop.f32.mrf.mxu3  ;;  %v3840_v45 = vld [vmem:[#allocation3 + $0x98] sm:$0xf0]  ;;  %v3537_v34 = vld [vmem:[#allocation3 + $0x9c] sm:$0xf0] }
 0x2b2   :  { %2229 = vst [vmem:[#allocation3 + $0xa8] sm:$0xff] %v2197_v37  ;;  %v1874_v58 = vadd.f32 %v1873_v31, %v1825_v63  ;;  %v3536_v32 = vor.u32 %v3840_v45, %v3535_v30  ;;  %v3540_v56 = vor.u32 %v3839_v7, %v3537_v34  ;;  %v1994_v37 = vadd.f32 %v1993_v44, %v1945_v28 }
 0x2b4   :  { %v1923_v50 = vadd.f32 %v1922_v1, %v1874_v58 }
 0x2b6   :  { %v2167_v9 = vmax.f32 %v1923_v50, 0.0 }
 0x2b8   :  { %v2199_v36 = vpack.c.bf16 %v2167_v9, %v2166_v35  ;;  %v1951_v63 = vpop.f32.mrf.mxu0  ;;  %v1947_v35 = vadd.f32 %v1946_v12, %v4731_v6  ;;  %v2000_v9 = vpop.f32.mrf.mxu1 }
 0x2b9   :  { %v2032_v23 = vpop.f32.mrf.mxu2  ;;  %v2081_v29 = vpop.f32.mrf.mxu3 }
 0x2ba   :  { %2231 = vst [vmem:[#allocation3 + $0xb4] sm:$0xff] %v2199_v36  ;;  %v2033_v33 = vadd.f32 %v2032_v23, %v1984_v47  ;;  %v3547_v36 = vld [vmem:[#allocation3 + $0xa8] sm:$0xf]  ;;  %v3842_v23 = vld [vmem:[#allocation3 + $0xac] sm:$0xf]  ;;  %v1996_v20 = vadd.f32 %v1995_v40, %v1947_v35 }
 0x2bc   :  { %v2082_v46 = vadd.f32 %v2081_v29, %v2033_v33 }
 0x2be   :  { %v2123_v4 = vmax.f32 %v2082_v46, 0.0 }
 0x2c0   :  { %v2170_v39 = vpack.c.bf16 %v2123_v4, %v2123_v4  ;;  %2622 = vmatmul.bf16.gmra.mxu0 %v3524_v5  ;;  %2671 = vmatmul.bf16.gmra.mxu1 %v3528_v48  ;;  %v1954_v42 = vpop.f32.mrf.mxu0  ;;  %v1950_v48 = vadd.f32 %v1949_v57, %v4731_v6 }
 0x2c1   :  { %v2034_v14 = vpop.f32.mrf.mxu2  ;;  %v2083_v17 = vpop.f32.mrf.mxu3  ;;  %v3843_v53 = vld [vmem:[#allocation3 + $0xb0] sm:$0xf0]  ;;  %v3549_v50 = vld [vmem:[#allocation3 + $0xb4] sm:$0xf0]  ;;  %v1955_v7 = vadd.f32 %v1954_v42, %v4731_v6 }
 0x2c2   :  { %2202 = vst [vmem:[#allocation3 + $0x8] sm:$0xf] %v2170_v39  ;;  %v2035_v43 = vadd.f32 %v2034_v14, %v1986_v11  ;;  %v3548_v21 = vor.u32 %v3843_v53, %v3547_v36  ;;  %v3552_v33 = vor.u32 %v3842_v23, %v3549_v50  ;;  %v2003_v39 = vpop.f32.mrf.mxu1 }
 0x2c4   :  { %v2084_v27 = vadd.f32 %v2083_v17, %v2035_v43  ;;  %v1999_v17 = vadd.f32 %v1998_v60, %v1950_v48 }
 0x2c6   :  { %v2126_v22 = vmax.f32 %v2084_v27, 0.0 }
 0x2c8   :  { %v2172_v16 = vpack.c.bf16 %v2126_v22, %v2126_v22  ;;  %v1956_v27 = vpop.f32.mrf.mxu0 }
 0x2c9   :  { %v2037_v38 = vpop.f32.mrf.mxu2  ;;  %v2086_v24 = vpop.f32.mrf.mxu3  ;;  %v3471_v2 = vld [vmem:[#allocation3 + $0x8] sm:$0xf]  ;;  %v1957_v60 = vadd.f32 %v1956_v27, %v4731_v6 }
 0x2ca   :  { %2204 = vst [vmem:[#allocation3 + $0x14] sm:$0xf] %v2172_v16  ;;  %v2038_v13 = vadd.f32 %v2037_v38, %v1989_v49  ;;  %v1952_v49 = vadd.f32 %v1951_v63, %v4731_v6 }
 0x2cc   :  { %v2087_v25 = vadd.f32 %v2086_v24, %v2038_v13  ;;  %v2001_v38 = vadd.f32 %v2000_v9, %v1952_v49  ;;  %v2005_v24 = vpop.f32.mrf.mxu1 }
 0x2ce   :  { %v2129_v59 = vmax.f32 %v2087_v25, 0.0 }
 0x2d0   :  { %v2174_v51 = vpack.c.bf16 %v2129_v59, %v2129_v59  ;;  %2627 = vmatmul.bf16.gmra.mxu0 %v3536_v32  ;;  %2676 = vmatmul.bf16.gmra.mxu1 %v3540_v56  ;;  %v1959_v59 = vpop.f32.mrf.mxu0 }
 0x2d1   :  { %v2039_v3 = vpop.f32.mrf.mxu2  ;;  %v2088_v15 = vpop.f32.mrf.mxu3  ;;  %v3823_v41 = vld [vmem:[#allocation3 + $0x10] sm:$0xf0]  ;;  %v1960_v53 = vadd.f32 %v1959_v59, %v4731_v6 }
 0x2d2   :  { %2206 = vst [vmem:[#allocation3 + $0x20] sm:$0xf] %v2174_v51  ;;  %v2040_v18 = vadd.f32 %v2039_v3, %v1991_v0  ;;  %v3472_v10 = vor.u32 %v3823_v41, %v3471_v2  ;;  %v2004_v0 = vadd.f32 %v2003_v39, %v1955_v7 }
 0x2d4   :  { %v2089_v62 = vadd.f32 %v2088_v15, %v2040_v18  ;;  %2695 = vmatmul.bf16.vlgmr.msra.gmra.mxu2 %v3472_v10  ;;  %v2008_v2 = vpop.f32.mrf.mxu1 }
 0x2d6   :  { %v2132_v61 = vmax.f32 %v2089_v62, 0.0  ;;  %v2006_v62 = vadd.f32 %v2005_v24, %v1957_v60 }
 0x2d8   :  { %v2176_v31 = vpack.c.bf16 %v2132_v61, %v2132_v61  ;;  %v1961_v10 = vpop.f32.mrf.mxu0 }
 0x2d9   :  { %v2042_v1 = vpop.f32.mrf.mxu2  ;;  %v2091_v58 = vpop.f32.mrf.mxu3  ;;  %v3483_v8 = vld [vmem:[#allocation3 + $0x20] sm:$0xf] }
 0x2da   :  { %2208 = vst [vmem:[#allocation3 + $0x2c] sm:$0xf] %v2176_v31  ;;  %v2043_v54 = vadd.f32 %v2042_v1, %v1994_v37 }
 0x2dc   :  { %v2092_v47 = vadd.f32 %v2091_v58, %v2043_v54  ;;  %v2010_v50 = vpop.f32.mrf.mxu1 }
 0x2de   :  { %v2135_v29 = vmax.f32 %v2092_v47, 0.0  ;;  %v2009_v47 = vadd.f32 %v2008_v2, %v1960_v53 }
 0x2e0   :  { %v2178_v19 = vpack.c.bf16 %v2135_v29, %v2135_v29  ;;  %2632 = vmatmul.bf16.gmra.mxu0 %v3548_v21  ;;  %2681 = vmatmul.bf16.gmra.mxu1 %v3552_v33  ;;  %v1964_v36 = vpop.f32.mrf.mxu0 }
 0x2e1   :  { %v2044_v46 = vpop.f32.mrf.mxu2  ;;  %v2093_v55 = vpop.f32.mrf.mxu3  ;;  %v3826_v44 = vld [vmem:[#allocation3 + $0x28] sm:$0xf0] }
 0x2e2   :  { %2210 = vst [vmem:[#allocation3 + $0x38] sm:$0xf] %v2178_v19  ;;  %v2045_v4 = vadd.f32 %v2044_v46, %v1996_v20  ;;  %v3484_v5 = vor.u32 %v3826_v44, %v3483_v8  ;;  %v1962_v20 = vadd.f32 %v1961_v10, %v4731_v6 }
 0x2e4   :  { %v2094_v11 = vadd.f32 %v2093_v55, %v2045_v4  ;;  %2700 = vmatmul.bf16.gmra.mxu2 %v3484_v5  ;;  %v2013_v19 = vpop.f32.mrf.mxu1  ;;  %v2011_v55 = vadd.f32 %v2010_v50, %v1962_v20 }
 0x2e6   :  { %v2138_v14 = vmax.f32 %v2094_v11, 0.0 }
 0x2e8   :  { %v2180_v12 = vpack.c.bf16 %v2138_v14, %v2138_v14  ;;  %v1966_v14 = vpop.f32.mrf.mxu0 }
 0x2e9   :  { %v2047_v43 = vpop.f32.mrf.mxu2  ;;  %v2096_v52 = vpop.f32.mrf.mxu3  ;;  %v3495_v26 = vld [vmem:[#allocation3 + $0x38] sm:$0xf] }
 0x2ea   :  { %2212 = vst [vmem:[#allocation3 + $0x44] sm:$0xf] %v2180_v12  ;;  %v2048_v22 = vadd.f32 %v2047_v43, %v1999_v17  ;;  %v1965_v17 = vadd.f32 %v1964_v36, %v4731_v6 }
 0x2ec   :  { %v2097_v40 = vadd.f32 %v2096_v52, %v2048_v22  ;;  %v2014_v52 = vadd.f32 %v2013_v19, %v1965_v17  ;;  %v2015_v27 = vpop.f32.mrf.mxu1 }
 0x2ee   :  { %v2141_v16 = vmax.f32 %v2097_v40, 0.0 }
 0x2f0   :  { %v2182_v13 = vpack.c.bf16 %v2141_v16, %v2141_v16 }
 0x2f1   :  { %v2049_v45 = vpop.f32.mrf.mxu2  ;;  %v2098_v34 = vpop.f32.mrf.mxu3  ;;  %v3829_v57 = vld [vmem:[#allocation3 + $0x40] sm:$0xf0] }
 0x2f2   :  { %2214 = vst [vmem:[#allocation3 + $0x50] sm:$0xf] %v2182_v13  ;;  %v2050_v25 = vadd.f32 %v2049_v45, %v2001_v38  ;;  %v3496_v30 = vor.u32 %v3829_v57, %v3495_v26  ;;  %v1967_v38 = vadd.f32 %v1966_v14, %v4731_v6  ;;  %v1969_v13 = vpop.f32.mrf.mxu0 }
 0x2f4   :  { %v2099_v32 = vadd.f32 %v2098_v34, %v2050_v25  ;;  %2705 = vmatmul.bf16.gmra.mxu2 %v3496_v30  ;;  %v2016_v34 = vadd.f32 %v2015_v27, %v1967_v38 }
 0x2f6   :  { %v2144_v56 = vmax.f32 %v2099_v32, 0.0 }
 0x2f8   :  { %v2184_v51 = vpack.c.bf16 %v2144_v56, %v2144_v56  ;;  %v2018_v56 = vpop.f32.mrf.mxu1 }
 0x2f9   :  { %v2052_v3 = vpop.f32.mrf.mxu2  ;;  %v2101_v15 = vpop.f32.mrf.mxu3  ;;  %v3507_v31 = vld [vmem:[#allocation3 + $0x50] sm:$0xf] }
 0x2fa   :  { %2216 = vst [vmem:[#allocation3 + $0x5c] sm:$0xf] %v2184_v51  ;;  %v2053_v41 = vadd.f32 %v2052_v3, %v2004_v0  ;;  %v1970_v0 = vadd.f32 %v1969_v13, %v4731_v6 }
 0x2fc   :  { %v2102_v18 = vadd.f32 %v2101_v15, %v2053_v41  ;;  %v1971_v15 = vpop.f32.mrf.mxu0  ;;  %v2019_v2 = vadd.f32 %v2018_v56, %v1970_v0 }
 0x2fe   :  { %v2147_v28 = vmax.f32 %v2102_v18, 0.0 }
 0x300   :  { %v2186_v63 = vpack.c.bf16 %v2147_v28, %v2147_v28  ;;  %v1972_v28 = vadd.f32 %v1971_v15, %v4731_v6 }
 0x301   :  { %v2054_v61 = vpop.f32.mrf.mxu2  ;;  %v2103_v37 = vpop.f32.mrf.mxu3  ;;  %v3832_v1 = vld [vmem:[#allocation3 + $0x58] sm:$0xf0] }
 0x302   :  { %2218 = vst [vmem:[#allocation3 + $0x68] sm:$0xf] %v2186_v63  ;;  %v2055_v58 = vadd.f32 %v2054_v61, %v2006_v62  ;;  %v3508_v54 = vor.u32 %v3832_v1, %v3507_v31  ;;  %v2020_v63 = vpop.f32.mrf.mxu1 }
 0x304   :  { %v2104_v35 = vadd.f32 %v2103_v37, %v2055_v58  ;;  %2710 = vmatmul.bf16.gmra.mxu2 %v3508_v54  ;;  %v2021_v37 = vadd.f32 %v2020_v63, %v1972_v28  ;;  %v2598_v1 = vpop.f32.mrf.mxu0 }
 0x306   :  { %v2150_v9 = vmax.f32 %v2104_v35, 0.0 }
 0x308   :  { %v2188_v23 = vpack.c.bf16 %v2150_v9, %v2150_v9 }
 0x309   :  { %v2057_v29 = vpop.f32.mrf.mxu2  ;;  %v2106_v21 = vpop.f32.mrf.mxu3  ;;  %v3519_v5 = vld [vmem:[#allocation3 + $0x68] sm:$0xf] }
 0x30a   :  { %2220 = vst [vmem:[#allocation3 + $0x74] sm:$0xf] %v2188_v23  ;;  %v2058_v33 = vadd.f32 %v2057_v29, %v2009_v47  ;;  %v2647_v23 = vpop.f32.mrf.mxu1 }
 0x30c   :  { %v2107_v42 = vadd.f32 %v2106_v21, %v2058_v33  ;;  %v2600_v6 = vpop.f32.mrf.mxu0 }
 0x30e   :  { %v2153_v46 = vmax.f32 %v2107_v42, 0.0 }
 0x310   :  { %v2190_v8 = vpack.c.bf16 %v2153_v46, %v2153_v46 }
 0x311   :  { %v2059_v44 = vpop.f32.mrf.mxu2  ;;  %v2108_v4 = vpop.f32.mrf.mxu3  ;;  %v3835_v48 = vld [vmem:[#allocation3 + $0x70] sm:$0xf0] }
 0x312   :  { %2222 = vst [vmem:[#allocation3 + $0x80] sm:$0xf] %v2190_v8  ;;  %v2060_v11 = vadd.f32 %v2059_v44, %v2011_v55  ;;  %v3520_v39 = vor.u32 %v3835_v48, %v3519_v5  ;;  %v2649_v21 = vpop.f32.mrf.mxu1  ;;  %v4758_v55 = vld [vmem:[%s4785_s6] ss:$0 sm:$0xff]  ;;  %s4104_s6 = smov [#allocation13]  }
 0x313   :  { %v2599_v44 = vadd.f32 %v4758_v55, %v2598_v1  ;;  %v2601_v14 = vadd.f32 %v4758_v55, %v2600_v6  ;;  %s2772_s9 = sshll.u32 %s4104_s6, 4  ;;  %s2773_s9 = int_to_ptr.vmem [resolvable:$true] %s2772_s9 }
 0x314   :  { %v2109_v12 = vadd.f32 %v2108_v4, %v2060_v11  ;;  %2715 = vmatmul.bf16.gmra.mxu2 %v3520_v39  ;;  %v2603_v19 = vpop.f32.mrf.mxu0 }
 0x315   :  { %v2648_v5 = vadd.f32 %v2647_v23, %v2599_v44  ;;  %v2650_v17 = vadd.f32 %v2649_v21, %v2601_v14 }
 0x316   :  { %v2156_v43 = vmax.f32 %v2109_v12, 0.0 }
 0x318   :  { %v2192_v22 = vpack.c.bf16 %v2156_v43, %v2156_v43 }
 0x319   :  { %v2062_v49 = vpop.f32.mrf.mxu2  ;;  %v2111_v40 = vpop.f32.mrf.mxu3  ;;  %v3531_v30 = vld [vmem:[#allocation3 + $0x80] sm:$0xf] }
 0x31a   :  { %2224 = vst [vmem:[#allocation3 + $0x8c] sm:$0xf] %v2192_v22  ;;  %v2063_v16 = vadd.f32 %v2062_v49, %v2014_v52  ;;  %v2652_v46 = vpop.f32.mrf.mxu1  ;;  %v2604_v22 = vadd.f32 %v4758_v55, %v2603_v19 }
 0x31c   :  { %v2112_v24 = vadd.f32 %v2111_v40, %v2063_v16  ;;  %v2605_v8 = vpop.f32.mrf.mxu0  ;;  %v2653_v40 = vadd.f32 %v2652_v46, %v2604_v22 }
 0x31e   :  { %v2159_v45 = vmax.f32 %v2112_v24, 0.0 }
 0x320   :  { %v2194_v26 = vpack.c.bf16 %v2159_v45, %v2159_v45  ;;  %v2606_v45 = vadd.f32 %v4758_v55, %v2605_v8 }
 0x321   :  { %v2064_v57 = vpop.f32.mrf.mxu2  ;;  %v2113_v25 = vpop.f32.mrf.mxu3  ;;  %v3838_v7 = vld [vmem:[#allocation3 + $0x88] sm:$0xf0] }
 0x322   :  { %2226 = vst [vmem:[#allocation3 + $0x98] sm:$0xf] %v2194_v26  ;;  %v2065_v59 = vadd.f32 %v2064_v57, %v2016_v34  ;;  %v3532_v32 = vor.u32 %v3838_v7, %v3531_v30  ;;  %v2654_v4 = vpop.f32.mrf.mxu1 }
 0x323   :  { %v2655_v26 = vadd.f32 %v2654_v4, %v2606_v45 }
 0x324   :  { %v2114_v51 = vadd.f32 %v2113_v25, %v2065_v59  ;;  %2720 = vmatmul.bf16.gmra.mxu2 %v3532_v32  ;;  %v2608_v39 = vpop.f32.mrf.mxu0 }
 0x325   :  { %v2609_v7 = vadd.f32 %v4758_v55, %v2608_v39 }
 0x326   :  { %v2162_v3 = vmax.f32 %v2114_v51, 0.0 }
 0x328   :  { %v2196_v41 = vpack.c.bf16 %v2162_v3, %v2162_v3 }
 0x329   :  { %v2067_v60 = vpop.f32.mrf.mxu2  ;;  %v2116_v18 = vpop.f32.mrf.mxu3  ;;  %v3543_v54 = vld [vmem:[#allocation3 + $0x98] sm:$0xf] }
 0x32a   :  { %2228 = vst [vmem:[#allocation3 + $0xa4] sm:$0xf] %v2196_v41  ;;  %v2068_v10 = vadd.f32 %v2067_v60, %v2019_v2  ;;  %v2657_v12 = vpop.f32.mrf.mxu1 }
 0x32b   :  { %v2658_v32 = vadd.f32 %v2657_v12, %v2609_v7 }
 0x32c   :  { %v2117_v62 = vadd.f32 %v2116_v18, %v2068_v10  ;;  %v2610_v49 = vpop.f32.mrf.mxu0 }
 0x32d   :  { %v2611_v15 = vadd.f32 %v4758_v55, %v2610_v49 }
 0x32e   :  { %v2165_v61 = vmax.f32 %v2117_v62, 0.0 }
 0x330   :  { %v2198_v31 = vpack.c.bf16 %v2165_v61, %v2165_v61 }
 0x331   :  { %v2069_v58 = vpop.f32.mrf.mxu2  ;;  %v3841_v53 = vld [vmem:[#allocation3 + $0xa0] sm:$0xf0]  ;;  %v2118_v9 = vpop.f32.mrf.mxu3 }
 0x332   :  { %2230 = vst [vmem:[#allocation3 + $0xb0] sm:$0xf] %v2198_v31  ;;  %v2070_v50 = vadd.f32 %v2069_v58, %v2021_v37  ;;  %v3544_v35 = vor.u32 %v3841_v53, %v3543_v54  ;;  %v2659_v13 = vpop.f32.mrf.mxu1 }
 0x333   :  { %v2660_v41 = vadd.f32 %v2659_v13, %v2611_v15 }
 0x334   :  { %v2119_v47 = vadd.f32 %v2118_v9, %v2070_v50  ;;  %2725 = vmatmul.bf16.gmra.mxu2 %v3544_v35  ;;  %v2613_v34 = vpop.f32.mrf.mxu0 }
 0x335   :  { %v2614_v62 = vadd.f32 %v4758_v55, %v2613_v34 }
 0x336   :  { %v2168_v36 = vmax.f32 %v2119_v47, 0.0 }
 0x338   :  { %v2200_v29 = vpack.c.bf16 %v2168_v36, %v2168_v36 }
 0x339   :  { %v3555_v33 = vld [vmem:[#allocation3 + $0xb0] sm:$0xf] }
 0x33a   :  { %2232 = vst [vmem:[#allocation3 + $0xbc] sm:$0xf] %v2200_v29  ;;  %v2662_v59 = vpop.f32.mrf.mxu1 }
 0x33b   :  { %v2663_v63 = vadd.f32 %v2662_v59, %v2614_v62 }
 0x33c   :  { %v2615_v56 = vpop.f32.mrf.mxu0 }
 0x33d   :  { %v2616_v58 = vadd.f32 %v4758_v55, %v2615_v56 }
 0x341   :  { %v3844_v20 = vld [vmem:[#allocation3 + $0xb8] sm:$0xf0] }
 0x342   :  { %v3556_v42 = vor.u32 %v3844_v20, %v3555_v33  ;;  %v2664_v2 = vpop.f32.mrf.mxu1 }
 0x343   :  { %v2665_v53 = vadd.f32 %v2664_v2, %v2616_v58 }
 0x344   :  { %2730 = vmatmul.bf16.gmra.mxu2 %v3556_v42  ;;  %v2618_v28 = vpop.f32.mrf.mxu0 }
 0x345   :  { %v2619_v36 = vadd.f32 %v4758_v55, %v2618_v28 }
 0x34a   :  { %v2667_v61 = vpop.f32.mrf.mxu1 }
 0x34b   :  { %v2668_v29 = vadd.f32 %v2667_v61, %v2619_v36 }
 0x34c   :  { %v2620_v54 = vpop.f32.mrf.mxu0 }
 0x34d   :  { %v2621_v20 = vadd.f32 %v4758_v55, %v2620_v54 }
 0x352   :  { %v2669_v47 = vpop.f32.mrf.mxu1 }
 0x353   :  { %v2670_v19 = vadd.f32 %v2669_v47, %v2621_v20 }
 0x354   :  { %v2623_v23 = vpop.f32.mrf.mxu0 }
 0x357   :  { %v2696_v48 = vpop.f32.mrf.mxu2 }
 0x358   :  { %v2697_v11 = vadd.f32 %v2696_v48, %v2648_v5  ;;  %v2624_v5 = vadd.f32 %v4758_v55, %v2623_v23 }
 0x35a   :  { %3908 = vtanh.f32 %v2697_v11  ;;  %v2672_v42 = vpop.f32.mrf.mxu1 }
 0x35b   :  { %v2673_v11 = vadd.f32 %v2672_v42, %v2624_v5 }
 0x35c   :  { %v2625_v46 = vpop.f32.mrf.mxu0 }
 0x35f   :  { %v2698_v43 = vpop.f32.mrf.mxu2 }
 0x360   :  { %v3909_v52 = vpop.eup %3908  ;;  %v2699_v27 = vadd.f32 %v2698_v43, %v2650_v17  ;;  %v2626_v43 = vadd.f32 %v4758_v55, %v2625_v46 }
 0x361   :  { %2752 = vst [vmem:[#allocation13] sm:$0xff] %v3909_v52 }
 0x362   :  { %3910 = vtanh.f32 %v2699_v27  ;;  %v2674_v48 = vpop.f32.mrf.mxu1 }
 0x363   :  { %v2675_v52 = vadd.f32 %v2674_v48, %v2626_v43 }
 0x364   :  { %v2628_v12 = vpop.f32.mrf.mxu0 }
 0x367   :  { %v2701_v16 = vpop.f32.mrf.mxu2 }
 0x368   :  { %v3911_v38 = vpop.eup %3910  ;;  %v2702_v24 = vadd.f32 %v2701_v16, %v2653_v40  ;;  %v2629_v16 = vadd.f32 %v4758_v55, %v2628_v12 }
 0x369   :  { %2753 = vst [vmem:[#allocation13 + $0x8] sm:$0xff] %v3911_v38 }
 0x36a   :  { %3912 = vtanh.f32 %v2702_v24  ;;  %v2677_v27 = vpop.f32.mrf.mxu1 }
 0x36b   :  { %v2678_v24 = vadd.f32 %v2677_v27, %v2629_v16 }
 0x36c   :  { %v2630_v38 = vpop.f32.mrf.mxu0 }
 0x36f   :  { %v2703_v57 = vpop.f32.mrf.mxu2 }
 0x370   :  { %v3913_v25 = vpop.eup %3912  ;;  %v2704_v30 = vadd.f32 %v2703_v57, %v2655_v26  ;;  %v2631_v57 = vadd.f32 %v4758_v55, %v2630_v38 }
 0x371   :  { %2754 = vst [vmem:[#allocation13 + $0x10] sm:$0xff] %v3913_v25 }
 0x372   :  { %3914 = vtanh.f32 %v2704_v30  ;;  %v2679_v26 = vpop.f32.mrf.mxu1 }
 0x373   :  { %v2680_v30 = vadd.f32 %v2679_v26, %v2631_v57 }
 0x374   :  { %v2633_v25 = vpop.f32.mrf.mxu0 }
 0x375   :  { %v2634_v56 = vadd.f32 %v4758_v55, %v2633_v25 }
 0x377   :  { %v2706_v0 = vpop.f32.mrf.mxu2 }
 0x378   :  { %v3915_v51 = vpop.eup %3914  ;;  %v2707_v3 = vadd.f32 %v2706_v0, %v2658_v32 }
 0x379   :  { %2755 = vst [vmem:[#allocation13 + $0x18] sm:$0xff] %v3915_v51 }
 0x37a   :  { %3916 = vtanh.f32 %v2707_v3  ;;  %v2682_v0 = vpop.f32.mrf.mxu1 }
 0x37b   :  { %v2683_v51 = vadd.f32 %v2682_v0, %v2634_v56 }
 0x37c   :  { %v2635_v3 = vpop.f32.mrf.mxu0 }
 0x37f   :  { %v2708_v60 = vpop.f32.mrf.mxu2 }
 0x380   :  { %v3917_v18 = vpop.eup %3916  ;;  %v2709_v10 = vadd.f32 %v2708_v60, %v2660_v41  ;;  %v2636_v60 = vadd.f32 %v4758_v55, %v2635_v3 }
 0x381   :  { %2756 = vst [vmem:[#allocation13 + $0x20] sm:$0xff] %v3917_v18 }
 0x382   :  { %3918 = vtanh.f32 %v2709_v10  ;;  %v2684_v18 = vpop.f32.mrf.mxu1 }
 0x383   :  { %v2685_v10 = vadd.f32 %v2684_v18, %v2636_v60 }
 0x387   :  { %v2711_v37 = vpop.f32.mrf.mxu2 }
 0x388   :  { %v3919_v31 = vpop.eup %3918  ;;  %v2712_v1 = vadd.f32 %v2711_v37, %v2663_v63 }
 0x389   :  { %2757 = vst [vmem:[#allocation13 + $0x28] sm:$0xff] %v3919_v31 }
 0x38a   :  { %3920 = vtanh.f32 %v2712_v1 }
 0x38f   :  { %v2713_v50 = vpop.f32.mrf.mxu2 }
 0x390   :  { %v3921_v35 = vpop.eup %3920  ;;  %v2714_v9 = vadd.f32 %v2713_v50, %v2665_v53 }
 0x391   :  { %2758 = vst [vmem:[#allocation13 + $0x30] sm:$0xff] %v3921_v35 }
 0x392   :  { %3922 = vtanh.f32 %v2714_v9 }
 0x397   :  { %v2716_v6 = vpop.f32.mrf.mxu2 }
 0x398   :  { %v3923_v21 = vpop.eup %3922  ;;  %v2717_v33 = vadd.f32 %v2716_v6, %v2668_v29 }
 0x399   :  { %2759 = vst [vmem:[#allocation13 + $0x38] sm:$0xff] %v3923_v21 }
 0x39a   :  { %3924 = vtanh.f32 %v2717_v33 }
 0x39f   :  { %v2718_v8 = vpop.f32.mrf.mxu2 }
 0x3a0   :  { %v3925_v44 = vpop.eup %3924  ;;  %v2719_v4 = vadd.f32 %v2718_v8, %v2670_v19 }
 0x3a1   :  { %2760 = vst [vmem:[#allocation13 + $0x40] sm:$0xff] %v3925_v44 }
 0x3a2   :  { %3926 = vtanh.f32 %v2719_v4 }
 0x3a7   :  { %v2721_v39 = vpop.f32.mrf.mxu2 }
 0x3a8   :  { %v3927_v14 = vpop.eup %3926  ;;  %v2722_v17 = vadd.f32 %v2721_v39, %v2673_v11 }
 0x3a9   :  { %2761 = vst [vmem:[#allocation13 + $0x48] sm:$0xff] %v3927_v14 }
 0x3aa   :  { %3928 = vtanh.f32 %v2722_v17 }
 0x3af   :  { %v2723_v22 = vpop.f32.mrf.mxu2 }
 0x3b0   :  { %v3929_v49 = vpop.eup %3928  ;;  %v2724_v40 = vadd.f32 %v2723_v22, %v2675_v52 }
 0x3b1   :  { %2762 = vst [vmem:[#allocation13 + $0x50] sm:$0xff] %v3929_v49 }
 0x3b2   :  { %3930 = vtanh.f32 %v2724_v40 }
 0x3b7   :  { %v2726_v13 = vpop.f32.mrf.mxu2 }
 0x3b8   :  { %v3931_v45 = vpop.eup %3930  ;;  %v2727_v34 = vadd.f32 %v2726_v13, %v2678_v24 }
 0x3b9   :  { %2763 = vst [vmem:[#allocation13 + $0x58] sm:$0xff] %v3931_v45 }
 0x3ba   :  { %3932 = vtanh.f32 %v2727_v34 }
 0x3bf   :  { %v2728_v7 = vpop.f32.mrf.mxu2 }
 0x3c0   :  { %v3933_v59 = vpop.eup %3932  ;;  %v2729_v32 = vadd.f32 %v2728_v7, %v2680_v30 }
 0x3c1   :  { %2764 = vst [vmem:[#allocation13 + $0x60] sm:$0xff] %v3933_v59 }
 0x3c2   :  { %3934 = vtanh.f32 %v2729_v32 }
 0x3c7   :  { %v2731_v15 = vpop.f32.mrf.mxu2 }
 0x3c8   :  { %v3935_v2 = vpop.eup %3934  ;;  %v2732_v41 = vadd.f32 %v2731_v15, %v2683_v51 }
 0x3c9   :  { %2765 = vst [vmem:[#allocation13 + $0x68] sm:$0xff] %v3935_v2 }
 0x3ca   :  { %3936 = vtanh.f32 %v2732_v41 }
 0x3cf   :  { %v2733_v28 = vpop.f32.mrf.mxu2 }
 0x3d0   :  { %v3937_v62 = vpop.eup %3936  ;;  %v2734_v63 = vadd.f32 %v2733_v28, %v2685_v10 }
 0x3d1   :  { %2766 = vst [vmem:[#allocation13 + $0x70] sm:$0xff] %v3937_v62 }
 0x3d2   :  { %3938 = vtanh.f32 %v2734_v63 }
 0x3d8   :  { %v3939_v61 = vpop.eup %3938 }
 0x3d9   :  { %2767 = vst [vmem:[#allocation13 + $0x78] sm:$0xff] %v3939_v61 }
 0x3da   :  { %2780 = dma.vmem_to_hbm [thread:$0]  %s2773_s9, 2048, %s2775_s12, [#allocation6], %s4105_s13, %s4105_s13, %s4106_s14  }
 0x3db   :  { %4091 = dma.done.wait [#allocation6], 2048  }
 0x3dc   :  { %4092 = vsyncadd [#allocation6], 4294965248 }
 0x3dd   :  { %2785 = vsyncpa [#allocation5], 1 }
 0x3de   :  { %2786 = vsyncpa [#allocation8], 1 }
 0x3df   :  { %2787 = vsyncpa [#allocation11], 1 }
 0x3e0   :  { %2788 = vsyncpa [#allocation6], 1 }

</bundles_post_ra>
